<compile_context>
chip_gen: v7x
topology: tpu7x:2x2x1
jax: 0.10.0
libtpu: 0.0.40
codegen_flags: <defaults>
</compile_context>

<pallas_src>
import jax
import jax.numpy as jnp
from jax import lax
from jax.experimental import pallas as pl
from jax.experimental.pallas import tpu as pltpu


# ----------------------------------------------------------------------------
# Fused Pallas kernel: 3 x (3x3 conv + bias + ReLU) for one batch element.
# ----------------------------------------------------------------------------
def _make_fused_kernel(H, W):
    HW = H * W
    L = (H + 2) * W + 2        # flat halo: 1 guard + (H+2) rows of W + 1 guard
    STRIP = W + 1              # guard + one pad row (front) / pad row + guard (back)

    def conv3x3(p_ref, w_ref, b_ref, lmask, rmask):
        """3x3 SAME conv + bias + ReLU from a row-padded flat halo buffer.

        p_ref : (Cin, L)        f32 halo scratch (pad rows already zero)
        w_ref : (9, Cout, Cin)  bf16 weights, tap index t = dy*3 + dx
        b_ref : (Cout, 1)       f32 bias
        lmask/rmask : (1, HW)   f32 {0,1} column masks for dx==0 / dx==2 taps
        returns (Cout, HW) f32 (post-ReLU), flat index j = h*W + w
        """
        src = p_ref[...]                                   # (Cin, L) f32
        cout = w_ref.shape[1]
        acc = jnp.zeros((cout, HW), jnp.float32)
        for t in range(9):
            dy, dx = divmod(t, 3)
            s = dy * W + dx                                # constant lane shift
            tap = src[:, s:s + HW]                         # contiguous slice
            if dx == 0:
                tap = tap * lmask                          # zero the w==0 column
            elif dx == 2:
                tap = tap * rmask                          # zero the w==W-1 column
            acc = acc + jnp.dot(w_ref[t], tap.astype(jnp.bfloat16),
                                preferred_element_type=jnp.float32)
        return jnp.maximum(acc + b_ref[...], 0.0)

    def kernel(x_ref, m_ref, w1_ref, b1_ref, w2_ref, b2_ref, w3_ref, b3_ref,
               o_ref, pin_ref, pmid_ref):
        # x_ref : (1, Cin, HW)   input (NCHW, spatial flattened)
        # m_ref : (2, HW)        [lmask; rmask] f32
        # o_ref : (1, Cout, HW)  lane-dense output (already NCHW order)
        cin = x_ref.shape[1]
        cmid = w1_ref.shape[1]
        lmask = m_ref[0:1, :]
        rmask = m_ref[1:2, :]

        # Layer 1: zero only the pad strips, write the interior once.
        zi = jnp.zeros((cin, STRIP), jnp.float32)
        pin_ref[:, 0:STRIP] = zi
        pin_ref[:, L - STRIP:L] = zi
        pin_ref[:, pl.ds(W + 1, HW)] = x_ref[0].astype(jnp.float32)
        a = conv3x3(pin_ref, w1_ref, b1_ref, lmask, rmask)

        # Layer 2: intermediate never leaves VMEM.
        zm = jnp.zeros((cmid, STRIP), jnp.float32)
        pmid_ref[:, 0:STRIP] = zm
        pmid_ref[:, L - STRIP:L] = zm
        pmid_ref[:, pl.ds(W + 1, HW)] = a
        a = conv3x3(pmid_ref, w2_ref, b2_ref, lmask, rmask)

        # Layer 3: reuse the same scratch (pad strips are still zero).
        pmid_ref[:, pl.ds(W + 1, HW)] = a
        a = conv3x3(pmid_ref, w3_ref, b3_ref, lmask, rmask)

        o_ref[0] = a.astype(o_ref.dtype)

    return kernel


def fused_conv_block(x_nchw, conv_params):
    """Three fused (3x3 conv, stride 1, pad 1, ReLU) layers. x_nchw: (N,Cin,H,W)."""
    N, Cin, H, W = x_nchw.shape
    (w1, b1), (w2, b2), (w3, b3) = conv_params
    Cout = w1.shape[-1]
    HW = H * W
    L = (H + 2) * W + 2

    def prep_w(w):   # HWIO (3,3,ci,co) -> (9, co, ci) bf16, tap index = dy*3+dx
        ci, co = w.shape[2], w.shape[3]
        return jnp.transpose(w, (0, 1, 3, 2)).reshape(9, co, ci).astype(jnp.bfloat16)

    def prep_b(b):
        return b.reshape(-1, 1).astype(jnp.float32)

    # {0,1} column masks for the left/right SAME-padding columns (tiny, host-built).
    col = jnp.arange(HW, dtype=jnp.int32) % W
    masks = jnp.stack([(col != 0), (col != W - 1)]).astype(jnp.float32)   # (2, HW)

    x_flat = x_nchw.reshape(N, Cin, HW)   # free metadata reshape (NCHW contiguous)

    out_flat = pl.pallas_call(
        _make_fused_kernel(H, W),
        out_shape=jax.ShapeDtypeStruct((N, Cout, HW), x_nchw.dtype),
        grid=(N,),
        in_specs=[
            pl.BlockSpec((1, Cin, HW), lambda n: (n, 0, 0)),
            pl.BlockSpec((2, HW), lambda n: (0, 0)),
            pl.BlockSpec((9, Cout, Cin), lambda n: (0, 0, 0)),
            pl.BlockSpec((Cout, 1), lambda n: (0, 0)),
            pl.BlockSpec((9, Cout, Cout), lambda n: (0, 0, 0)),
            pl.BlockSpec((Cout, 1), lambda n: (0, 0)),
            pl.BlockSpec((9, Cout, Cout), lambda n: (0, 0, 0)),
            pl.BlockSpec((Cout, 1), lambda n: (0, 0)),
        ],
        out_specs=pl.BlockSpec((1, Cout, HW), lambda n: (n, 0, 0)),
        scratch_shapes=[
            pltpu.VMEM((Cin, L), jnp.float32),     # layer-1 halo
            pltpu.VMEM((Cout, L), jnp.float32),    # layer-2/3 halo (reused)
        ],
        compiler_params=pltpu.CompilerParams(
            dimension_semantics=("parallel",)),
    )(x_flat, masks, prep_w(w1), prep_b(b1), prep_w(w2), prep_b(b2),
      prep_w(w3), prep_b(b3))
    return out_flat.reshape(N, Cout, H, W)   # free metadata reshape


# ----------------------------------------------------------------------------
# Parameter init (deterministic, matches shapes implied by BasicConv.__init__)
# ----------------------------------------------------------------------------
def init_basic_conv_params(key, in_channels, out_channels, att_rate=16,
                           channel_att=False, spatial_att=False):
    params = {}
    keys = jax.random.split(key, 12)
    ki = iter(range(12))

    def conv_init(k, kh, kw, cin, cout):
        kw_, kb_ = jax.random.split(k)
        fan_in = kh * kw * cin
        scale = 1.0 / jnp.sqrt(jnp.float32(fan_in))
        w = jax.random.uniform(kw_, (kh, kw, cin, cout), jnp.float32,
                               -scale, scale)
        b = jax.random.uniform(kb_, (cout,), jnp.float32, -scale, scale)
        return w, b

    params["conv_block"] = [
        conv_init(keys[next(ki)], 3, 3, in_channels, out_channels),
        conv_init(keys[next(ki)], 3, 3, out_channels, out_channels),
        conv_init(keys[next(ki)], 3, 3, out_channels, out_channels),
    ]
    if channel_att:
        hidden = out_channels // att_rate
        params["channel_att_block"] = [
            conv_init(keys[next(ki)], 1, 1, 2 * out_channels, hidden),
            conv_init(keys[next(ki)], 1, 1, hidden, out_channels),
        ]
    if spatial_att:
        params["spatial_att_block"] = [
            conv_init(keys[next(ki)], 7, 7, 2, 1),
        ]
    return params


# ----------------------------------------------------------------------------
# Forward pass (NCHW in / NCHW out, matching the PyTorch module; no transposes)
# ----------------------------------------------------------------------------
def basic_conv_forward(params, x_nchw, channel_att=False, spatial_att=False):
    x = fused_conv_block(x_nchw, params["conv_block"])

    if channel_att:
        # Plain-JAX glue (negligible compute; off by default in the module).
        avg = jnp.mean(x, axis=(2, 3), keepdims=True)            # (N,C,1,1)
        mx = jnp.max(x, axis=(2, 3), keepdims=True)              # (N,C,1,1)
        pool = jnp.concatenate([avg, mx], axis=1)                # (N,2C,1,1)
        (w1, b1), (w2, b2) = params["channel_att_block"]
        h = jnp.einsum("nchw,cd->ndhw", pool, w1[0, 0]) + b1.reshape(1, -1, 1, 1)
        h = jnp.maximum(h, 0.0)
        att = jax.nn.sigmoid(jnp.einsum("nchw,cd->ndhw", h, w2[0, 0])
                             + b2.reshape(1, -1, 1, 1))
        x = x * att

    if spatial_att:
        mean_c = jnp.mean(x, axis=1, keepdims=True)              # (N,1,H,W)
        max_c = jnp.max(x, axis=1, keepdims=True)                # (N,1,H,W)
        pool = jnp.concatenate([mean_c, max_c], axis=1)          # (N,2,H,W)
        (ws, bs), = params["spatial_att_block"]
        att = lax.conv_general_dilated(
            pool, ws, window_strides=(1, 1), padding="SAME",
            dimension_numbers=("NCHW", "HWIO", "NCHW")) + bs.reshape(1, -1, 1, 1)
        x = x * jax.nn.sigmoid(att)

    return x


# ----------------------------------------------------------------------------
# Reference: same conv block with bf16 matmul operands / f32 accumulate,
# mirroring the kernel's numeric recipe (so the comparison is tight).
# ----------------------------------------------------------------------------
def _reference_conv_block(params, x_nchw):
    x = x_nchw
    for w, b in params["conv_block"]:
        y = lax.conv_general_dilated(
            x.astype(jnp.bfloat16), w.astype(jnp.bfloat16),
            window_strides=(1, 1), padding="SAME",
            dimension_numbers=("NCHW", "HWIO", "NCHW"),
            preferred_element_type=jnp.float32)
        x = jnp.maximum(y + b.reshape(1, -1, 1, 1), 0.0)
    return x


if __name__ == "__main__":
    key = jax.random.PRNGKey(0)
    k_param, k_data = jax.random.split(key)

    batch, in_channels, out_channels, hw = 2, 4, 8, 16
    x = jax.random.normal(k_data, (batch, in_channels, hw, hw), jnp.float32)

    # Default BasicConv config: channel_att=False, spatial_att=False.
    params = init_basic_conv_params(k_param, in_channels, out_channels)

    out = jax.block_until_ready(basic_conv_forward(params, x))
    assert out.shape == (batch, out_channels, hw, hw), out.shape

    ref = jax.block_until_ready(_reference_conv_block(params, x))
    max_err = float(jnp.max(jnp.abs(out - ref)))
    assert jnp.allclose(out, ref, atol=1e-3, rtol=1e-3), max_err

    print("KERNEL_OK")
</pallas_src>

<mosaic_0001>
module attributes {stable_mosaic.version = 11 : i64} {
  func.func @kernel(%arg0: i32, %arg1: memref<1x4x256xf32, #tpu.memory_space<vmem>>, %arg2: memref<2x256xf32, #tpu.memory_space<vmem>>, %arg3: memref<9x8x4xbf16, #tpu.memory_space<vmem>>, %arg4: memref<8x1xf32, #tpu.memory_space<vmem>>, %arg5: memref<9x8x8xbf16, #tpu.memory_space<vmem>>, %arg6: memref<8x1xf32, #tpu.memory_space<vmem>>, %arg7: memref<9x8x8xbf16, #tpu.memory_space<vmem>>, %arg8: memref<8x1xf32, #tpu.memory_space<vmem>>, %arg9: memref<1x8x256xf32, #tpu.memory_space<vmem>>, %arg10: memref<4x290xf32, #tpu.memory_space<vmem>>, %arg11: memref<8x290xf32, #tpu.memory_space<vmem>>) attributes {dimension_semantics = [#tpu.dimension_semantics<parallel>], iteration_bounds = array<i64: 2>, scalar_prefetch = 0 : i64, scratch_operands = 2 : i64, tpu.core_type = #tpu.core_type<tc>, window_params = [{transform_indices = @transform_0, window_bounds = array<i64: 1, 4, 256>}, {pipeline_mode = #tpu.pipeline_mode<synchronous>, transform_indices = @transform_1, window_bounds = array<i64: 2, 256>}, {pipeline_mode = #tpu.pipeline_mode<synchronous>, transform_indices = @transform_2, window_bounds = array<i64: 9, 8, 4>}, {pipeline_mode = #tpu.pipeline_mode<synchronous>, transform_indices = @transform_3, window_bounds = array<i64: 8, 1>}, {pipeline_mode = #tpu.pipeline_mode<synchronous>, transform_indices = @transform_4, window_bounds = array<i64: 9, 8, 8>}, {pipeline_mode = #tpu.pipeline_mode<synchronous>, transform_indices = @transform_5, window_bounds = array<i64: 8, 1>}, {pipeline_mode = #tpu.pipeline_mode<synchronous>, transform_indices = @transform_6, window_bounds = array<i64: 9, 8, 8>}, {pipeline_mode = #tpu.pipeline_mode<synchronous>, transform_indices = @transform_7, window_bounds = array<i64: 8, 1>}, {transform_indices = @transform_8, window_bounds = array<i64: 1, 8, 256>}]} {
    %c0 = arith.constant 0 : index
    %c0_0 = arith.constant 0 : index
    %0 = vector.load %arg2[%c0, %c0_0] : memref<2x256xf32, #tpu.memory_space<vmem>>, vector<1x256xf32>
    %c1 = arith.constant 1 : index
    %c0_1 = arith.constant 0 : index
    %1 = vector.load %arg2[%c1, %c0_1] : memref<2x256xf32, #tpu.memory_space<vmem>>, vector<1x256xf32>
    %cst = arith.constant 0.000000e+00 : f32
    %2 = vector.broadcast %cst : f32 to vector<4x17xf32>
    %c0_2 = arith.constant 0 : index
    %c0_3 = arith.constant 0 : index
    %3 = vector.load %arg10[%c0_2, %c0_3] : memref<4x290xf32, #tpu.memory_space<vmem>>, vector<4x17xf32>
    tpu.vector_store %arg10[%c0_2, %c0_3], %2 {strides = array<i32>} : memref<4x290xf32, #tpu.memory_space<vmem>>, vector<4x17xf32>,
    %c0_4 = arith.constant 0 : index
    %c273 = arith.constant 273 : index
    %4 = vector.load %arg10[%c0_4, %c273] : memref<4x290xf32, #tpu.memory_space<vmem>>, vector<4x17xf32>
    tpu.vector_store %arg10[%c0_4, %c273], %2 {strides = array<i32>} : memref<4x290xf32, #tpu.memory_space<vmem>>, vector<4x17xf32>,
    %c0_5 = arith.constant 0 : index
    %c0_6 = arith.constant 0 : index
    %c0_7 = arith.constant 0 : index
    %5 = vector.load %arg1[%c0_5, %c0_6, %c0_7] : memref<1x4x256xf32, #tpu.memory_space<vmem>>, vector<1x4x256xf32>
    %6 = vector.shape_cast %5 : vector<1x4x256xf32> to vector<4x256xf32>
    %c0_8 = arith.constant 0 : index
    %c17 = arith.constant 17 : index
    %7 = vector.load %arg10[%c0_8, %c17] : memref<4x290xf32, #tpu.memory_space<vmem>>, vector<4x256xf32>
    tpu.vector_store %arg10[%c0_8, %c17], %6 {strides = array<i32>} : memref<4x290xf32, #tpu.memory_space<vmem>>, vector<4x256xf32>,
    %c0_9 = arith.constant 0 : index
    %c0_10 = arith.constant 0 : index
    %8 = vector.load %arg10[%c0_9, %c0_10] : memref<4x290xf32, #tpu.memory_space<vmem>>, vector<4x290xf32>
    %cst_11 = arith.constant 0.000000e+00 : f32
    %9 = vector.broadcast %cst_11 : f32 to vector<8x256xf32>
    %10 = vector.extract_strided_slice %8 {offsets = [0, 0], sizes = [4, 256], strides = [1, 1]} : vector<4x290xf32> to vector<4x256xf32>
    %11 = vector.broadcast %0 : vector<1x256xf32> to vector<4x256xf32>
    %12 = arith.mulf %10, %11 : vector<4x256xf32>
    %c0_12 = arith.constant 0 : index
    %c0_13 = arith.constant 0 : index
    %c0_14 = arith.constant 0 : index
    %13 = vector.load %arg3[%c0_12, %c0_13, %c0_14] : memref<9x8x4xbf16, #tpu.memory_space<vmem>>, vector<1x8x4xbf16>
    %14 = vector.shape_cast %13 : vector<1x8x4xbf16> to vector<8x4xbf16>
    %15 = arith.truncf %12 : vector<4x256xf32> to vector<4x256xbf16>
    %cst_15 = arith.constant dense<0.000000e+00> : vector<8x256xf32>
    %16 = tpu.matmul %14, %15, %cst_15 {dimension_numbers = #tpu.dot_dimension_numbers<[1], [0], [0], [1], [0, 0, 1, 1], [], []>} : vector<8x4xbf16>, vector<4x256xbf16>, vector<8x256xf32> -> vector<8x256xf32>
    %17 = arith.addf %9, %16 : vector<8x256xf32>
    %18 = vector.extract_strided_slice %8 {offsets = [0, 1], sizes = [4, 256], strides = [1, 1]} : vector<4x290xf32> to vector<4x256xf32>
    %c1_16 = arith.constant 1 : index
    %c0_17 = arith.constant 0 : index
    %c0_18 = arith.constant 0 : index
    %19 = vector.load %arg3[%c1_16, %c0_17, %c0_18] : memref<9x8x4xbf16, #tpu.memory_space<vmem>>, vector<1x8x4xbf16>
    %20 = vector.shape_cast %19 : vector<1x8x4xbf16> to vector<8x4xbf16>
    %21 = arith.truncf %18 : vector<4x256xf32> to vector<4x256xbf16>
    %cst_19 = arith.constant dense<0.000000e+00> : vector<8x256xf32>
    %22 = tpu.matmul %20, %21, %cst_19 {dimension_numbers = #tpu.dot_dimension_numbers<[1], [0], [0], [1], [0, 0, 1, 1], [], []>} : vector<8x4xbf16>, vector<4x256xbf16>, vector<8x256xf32> -> vector<8x256xf32>
    %23 = arith.addf %17, %22 : vector<8x256xf32>
    %24 = vector.extract_strided_slice %8 {offsets = [0, 2], sizes = [4, 256], strides = [1, 1]} : vector<4x290xf32> to vector<4x256xf32>
    %25 = vector.broadcast %1 : vector<1x256xf32> to vector<4x256xf32>
    %26 = arith.mulf %24, %25 : vector<4x256xf32>
    %c2 = arith.constant 2 : index
    %c0_20 = arith.constant 0 : index
    %c0_21 = arith.constant 0 : index
    %27 = vector.load %arg3[%c2, %c0_20, %c0_21] : memref<9x8x4xbf16, #tpu.memory_space<vmem>>, vector<1x8x4xbf16>
    %28 = vector.shape_cast %27 : vector<1x8x4xbf16> to vector<8x4xbf16>
    %29 = arith.truncf %26 : vector<4x256xf32> to vector<4x256xbf16>
    %cst_22 = arith.constant dense<0.000000e+00> : vector<8x256xf32>
    %30 = tpu.matmul %28, %29, %cst_22 {dimension_numbers = #tpu.dot_dimension_numbers<[1], [0], [0], [1], [0, 0, 1, 1], [], []>} : vector<8x4xbf16>, vector<4x256xbf16>, vector<8x256xf32> -> vector<8x256xf32>
    %31 = arith.addf %23, %30 : vector<8x256xf32>
    %32 = vector.extract_strided_slice %8 {offsets = [0, 16], sizes = [4, 256], strides = [1, 1]} : vector<4x290xf32> to vector<4x256xf32>
    %33 = vector.broadcast %0 : vector<1x256xf32> to vector<4x256xf32>
    %34 = arith.mulf %32, %33 : vector<4x256xf32>
    %c3 = arith.constant 3 : index
    %c0_23 = arith.constant 0 : index
    %c0_24 = arith.constant 0 : index
    %35 = vector.load %arg3[%c3, %c0_23, %c0_24] : memref<9x8x4xbf16, #tpu.memory_space<vmem>>, vector<1x8x4xbf16>
    %36 = vector.shape_cast %35 : vector<1x8x4xbf16> to vector<8x4xbf16>
    %37 = arith.truncf %34 : vector<4x256xf32> to vector<4x256xbf16>
    %cst_25 = arith.constant dense<0.000000e+00> : vector<8x256xf32>
    %38 = tpu.matmul %36, %37, %cst_25 {dimension_numbers = #tpu.dot_dimension_numbers<[1], [0], [0], [1], [0, 0, 1, 1], [], []>} : vector<8x4xbf16>, vector<4x256xbf16>, vector<8x256xf32> -> vector<8x256xf32>
    %39 = arith.addf %31, %38 : vector<8x256xf32>
    %40 = vector.extract_strided_slice %8 {offsets = [0, 17], sizes = [4, 256], strides = [1, 1]} : vector<4x290xf32> to vector<4x256xf32>
    %c4 = arith.constant 4 : index
    %c0_26 = arith.constant 0 : index
    %c0_27 = arith.constant 0 : index
    %41 = vector.load %arg3[%c4, %c0_26, %c0_27] : memref<9x8x4xbf16, #tpu.memory_space<vmem>>, vector<1x8x4xbf16>
    %42 = vector.shape_cast %41 : vector<1x8x4xbf16> to vector<8x4xbf16>
    %43 = arith.truncf %40 : vector<4x256xf32> to vector<4x256xbf16>
    %cst_28 = arith.constant dense<0.000000e+00> : vector<8x256xf32>
    %44 = tpu.matmul %42, %43, %cst_28 {dimension_numbers = #tpu.dot_dimension_numbers<[1], [0], [0], [1], [0, 0, 1, 1], [], []>} : vector<8x4xbf16>, vector<4x256xbf16>, vector<8x256xf32> -> vector<8x256xf32>
    %45 = arith.addf %39, %44 : vector<8x256xf32>
    %46 = vector.extract_strided_slice %8 {offsets = [0, 18], sizes = [4, 256], strides = [1, 1]} : vector<4x290xf32> to vector<4x256xf32>
    %47 = vector.broadcast %1 : vector<1x256xf32> to vector<4x256xf32>
    %48 = arith.mulf %46, %47 : vector<4x256xf32>
    %c5 = arith.constant 5 : index
    %c0_29 = arith.constant 0 : index
    %c0_30 = arith.constant 0 : index
    %49 = vector.load %arg3[%c5, %c0_29, %c0_30] : memref<9x8x4xbf16, #tpu.memory_space<vmem>>, vector<1x8x4xbf16>
    %50 = vector.shape_cast %49 : vector<1x8x4xbf16> to vector<8x4xbf16>
    %51 = arith.truncf %48 : vector<4x256xf32> to vector<4x256xbf16>
    %cst_31 = arith.constant dense<0.000000e+00> : vector<8x256xf32>
    %52 = tpu.matmul %50, %51, %cst_31 {dimension_numbers = #tpu.dot_dimension_numbers<[1], [0], [0], [1], [0, 0, 1, 1], [], []>} : vector<8x4xbf16>, vector<4x256xbf16>, vector<8x256xf32> -> vector<8x256xf32>
    %53 = arith.addf %45, %52 : vector<8x256xf32>
    %54 = vector.extract_strided_slice %8 {offsets = [0, 32], sizes = [4, 256], strides = [1, 1]} : vector<4x290xf32> to vector<4x256xf32>
    %55 = vector.broadcast %0 : vector<1x256xf32> to vector<4x256xf32>
    %56 = arith.mulf %54, %55 : vector<4x256xf32>
    %c6 = arith.constant 6 : index
    %c0_32 = arith.constant 0 : index
    %c0_33 = arith.constant 0 : index
    %57 = vector.load %arg3[%c6, %c0_32, %c0_33] : memref<9x8x4xbf16, #tpu.memory_space<vmem>>, vector<1x8x4xbf16>
    %58 = vector.shape_cast %57 : vector<1x8x4xbf16> to vector<8x4xbf16>
    %59 = arith.truncf %56 : vector<4x256xf32> to vector<4x256xbf16>
    %cst_34 = arith.constant dense<0.000000e+00> : vector<8x256xf32>
    %60 = tpu.matmul %58, %59, %cst_34 {dimension_numbers = #tpu.dot_dimension_numbers<[1], [0], [0], [1], [0, 0, 1, 1], [], []>} : vector<8x4xbf16>, vector<4x256xbf16>, vector<8x256xf32> -> vector<8x256xf32>
    %61 = arith.addf %53, %60 : vector<8x256xf32>
    %62 = vector.extract_strided_slice %8 {offsets = [0, 33], sizes = [4, 256], strides = [1, 1]} : vector<4x290xf32> to vector<4x256xf32>
    %c7 = arith.constant 7 : index
    %c0_35 = arith.constant 0 : index
    %c0_36 = arith.constant 0 : index
    %63 = vector.load %arg3[%c7, %c0_35, %c0_36] : memref<9x8x4xbf16, #tpu.memory_space<vmem>>, vector<1x8x4xbf16>
    %64 = vector.shape_cast %63 : vector<1x8x4xbf16> to vector<8x4xbf16>
    %65 = arith.truncf %62 : vector<4x256xf32> to vector<4x256xbf16>
    %cst_37 = arith.constant dense<0.000000e+00> : vector<8x256xf32>
    %66 = tpu.matmul %64, %65, %cst_37 {dimension_numbers = #tpu.dot_dimension_numbers<[1], [0], [0], [1], [0, 0, 1, 1], [], []>} : vector<8x4xbf16>, vector<4x256xbf16>, vector<8x256xf32> -> vector<8x256xf32>
    %67 = arith.addf %61, %66 : vector<8x256xf32>
    %68 = vector.extract_strided_slice %8 {offsets = [0, 34], sizes = [4, 256], strides = [1, 1]} : vector<4x290xf32> to vector<4x256xf32>
    %69 = vector.broadcast %1 : vector<1x256xf32> to vector<4x256xf32>
    %70 = arith.mulf %68, %69 : vector<4x256xf32>
    %c8 = arith.constant 8 : index
    %c0_38 = arith.constant 0 : index
    %c0_39 = arith.constant 0 : index
    %71 = vector.load %arg3[%c8, %c0_38, %c0_39] : memref<9x8x4xbf16, #tpu.memory_space<vmem>>, vector<1x8x4xbf16>
    %72 = vector.shape_cast %71 : vector<1x8x4xbf16> to vector<8x4xbf16>
    %73 = arith.truncf %70 : vector<4x256xf32> to vector<4x256xbf16>
    %cst_40 = arith.constant dense<0.000000e+00> : vector<8x256xf32>
    %74 = tpu.matmul %72, %73, %cst_40 {dimension_numbers = #tpu.dot_dimension_numbers<[1], [0], [0], [1], [0, 0, 1, 1], [], []>} : vector<8x4xbf16>, vector<4x256xbf16>, vector<8x256xf32> -> vector<8x256xf32>
    %75 = arith.addf %67, %74 : vector<8x256xf32>
    %c0_41 = arith.constant 0 : index
    %c0_42 = arith.constant 0 : index
    %76 = vector.load %arg4[%c0_41, %c0_42] : memref<8x1xf32, #tpu.memory_space<vmem>>, vector<8x1xf32>
    %77 = vector.broadcast %76 : vector<8x1xf32> to vector<8x256xf32>
    %78 = arith.addf %75, %77 : vector<8x256xf32>
    %cst_43 = arith.constant 0.000000e+00 : f32
    %79 = vector.broadcast %cst_43 : f32 to vector<8x256xf32>
    %80 = arith.maximumf %78, %79 : vector<8x256xf32>
    %cst_44 = arith.constant 0.000000e+00 : f32
    %81 = vector.broadcast %cst_44 : f32 to vector<8x17xf32>
    %c0_45 = arith.constant 0 : index
    %c0_46 = arith.constant 0 : index
    %82 = vector.load %arg11[%c0_45, %c0_46] : memref<8x290xf32, #tpu.memory_space<vmem>>, vector<8x17xf32>
    tpu.vector_store %arg11[%c0_45, %c0_46], %81 {strides = array<i32>} : memref<8x290xf32, #tpu.memory_space<vmem>>, vector<8x17xf32>,
    %c0_47 = arith.constant 0 : index
    %c273_48 = arith.constant 273 : index
    %83 = vector.load %arg11[%c0_47, %c273_48] : memref<8x290xf32, #tpu.memory_space<vmem>>, vector<8x17xf32>
    tpu.vector_store %arg11[%c0_47, %c273_48], %81 {strides = array<i32>} : memref<8x290xf32, #tpu.memory_space<vmem>>, vector<8x17xf32>,
    %c0_49 = arith.constant 0 : index
    %c17_50 = arith.constant 17 : index
    %84 = vector.load %arg11[%c0_49, %c17_50] : memref<8x290xf32, #tpu.memory_space<vmem>>, vector<8x256xf32>
    tpu.vector_store %arg11[%c0_49, %c17_50], %80 {strides = array<i32>} : memref<8x290xf32, #tpu.memory_space<vmem>>, vector<8x256xf32>,
    %c0_51 = arith.constant 0 : index
    %c0_52 = arith.constant 0 : index
    %85 = vector.load %arg11[%c0_51, %c0_52] : memref<8x290xf32, #tpu.memory_space<vmem>>, vector<8x290xf32>
    %cst_53 = arith.constant 0.000000e+00 : f32
    %86 = vector.broadcast %cst_53 : f32 to vector<8x256xf32>
    %87 = vector.extract_strided_slice %85 {offsets = [0, 0], sizes = [8, 256], strides = [1, 1]} : vector<8x290xf32> to vector<8x256xf32>
    %88 = vector.broadcast %0 : vector<1x256xf32> to vector<8x256xf32>
    %89 = arith.mulf %87, %88 : vector<8x256xf32>
    %c0_54 = arith.constant 0 : index
    %c0_55 = arith.constant 0 : index
    %c0_56 = arith.constant 0 : index
    %90 = vector.load %arg5[%c0_54, %c0_55, %c0_56] : memref<9x8x8xbf16, #tpu.memory_space<vmem>>, vector<1x8x8xbf16>
    %91 = vector.shape_cast %90 : vector<1x8x8xbf16> to vector<8x8xbf16>
    %92 = arith.truncf %89 : vector<8x256xf32> to vector<8x256xbf16>
    %cst_57 = arith.constant dense<0.000000e+00> : vector<8x256xf32>
    %93 = tpu.matmul %91, %92, %cst_57 {dimension_numbers = #tpu.dot_dimension_numbers<[1], [0], [0], [1], [0, 0, 1, 1], [], []>} : vector<8x8xbf16>, vector<8x256xbf16>, vector<8x256xf32> -> vector<8x256xf32>
    %94 = arith.addf %86, %93 : vector<8x256xf32>
    %95 = vector.extract_strided_slice %85 {offsets = [0, 1], sizes = [8, 256], strides = [1, 1]} : vector<8x290xf32> to vector<8x256xf32>
    %c1_58 = arith.constant 1 : index
    %c0_59 = arith.constant 0 : index
    %c0_60 = arith.constant 0 : index
    %96 = vector.load %arg5[%c1_58, %c0_59, %c0_60] : memref<9x8x8xbf16, #tpu.memory_space<vmem>>, vector<1x8x8xbf16>
    %97 = vector.shape_cast %96 : vector<1x8x8xbf16> to vector<8x8xbf16>
    %98 = arith.truncf %95 : vector<8x256xf32> to vector<8x256xbf16>
    %cst_61 = arith.constant dense<0.000000e+00> : vector<8x256xf32>
    %99 = tpu.matmul %97, %98, %cst_61 {dimension_numbers = #tpu.dot_dimension_numbers<[1], [0], [0], [1], [0, 0, 1, 1], [], []>} : vector<8x8xbf16>, vector<8x256xbf16>, vector<8x256xf32> -> vector<8x256xf32>
    %100 = arith.addf %94, %99 : vector<8x256xf32>
    %101 = vector.extract_strided_slice %85 {offsets = [0, 2], sizes = [8, 256], strides = [1, 1]} : vector<8x290xf32> to vector<8x256xf32>
    %102 = vector.broadcast %1 : vector<1x256xf32> to vector<8x256xf32>
    %103 = arith.mulf %101, %102 : vector<8x256xf32>
    %c2_62 = arith.constant 2 : index
    %c0_63 = arith.constant 0 : index
    %c0_64 = arith.constant 0 : index
    %104 = vector.load %arg5[%c2_62, %c0_63, %c0_64] : memref<9x8x8xbf16, #tpu.memory_space<vmem>>, vector<1x8x8xbf16>
    %105 = vector.shape_cast %104 : vector<1x8x8xbf16> to vector<8x8xbf16>
    %106 = arith.truncf %103 : vector<8x256xf32> to vector<8x256xbf16>
    %cst_65 = arith.constant dense<0.000000e+00> : vector<8x256xf32>
    %107 = tpu.matmul %105, %106, %cst_65 {dimension_numbers = #tpu.dot_dimension_numbers<[1], [0], [0], [1], [0, 0, 1, 1], [], []>} : vector<8x8xbf16>, vector<8x256xbf16>, vector<8x256xf32> -> vector<8x256xf32>
    %108 = arith.addf %100, %107 : vector<8x256xf32>
    %109 = vector.extract_strided_slice %85 {offsets = [0, 16], sizes = [8, 256], strides = [1, 1]} : vector<8x290xf32> to vector<8x256xf32>
    %110 = vector.broadcast %0 : vector<1x256xf32> to vector<8x256xf32>
    %111 = arith.mulf %109, %110 : vector<8x256xf32>
    %c3_66 = arith.constant 3 : index
    %c0_67 = arith.constant 0 : index
    %c0_68 = arith.constant 0 : index
    %112 = vector.load %arg5[%c3_66, %c0_67, %c0_68] : memref<9x8x8xbf16, #tpu.memory_space<vmem>>, vector<1x8x8xbf16>
    %113 = vector.shape_cast %112 : vector<1x8x8xbf16> to vector<8x8xbf16>
    %114 = arith.truncf %111 : vector<8x256xf32> to vector<8x256xbf16>
    %cst_69 = arith.constant dense<0.000000e+00> : vector<8x256xf32>
    %115 = tpu.matmul %113, %114, %cst_69 {dimension_numbers = #tpu.dot_dimension_numbers<[1], [0], [0], [1], [0, 0, 1, 1], [], []>} : vector<8x8xbf16>, vector<8x256xbf16>, vector<8x256xf32> -> vector<8x256xf32>
    %116 = arith.addf %108, %115 : vector<8x256xf32>
    %117 = vector.extract_strided_slice %85 {offsets = [0, 17], sizes = [8, 256], strides = [1, 1]} : vector<8x290xf32> to vector<8x256xf32>
    %c4_70 = arith.constant 4 : index
    %c0_71 = arith.constant 0 : index
    %c0_72 = arith.constant 0 : index
    %118 = vector.load %arg5[%c4_70, %c0_71, %c0_72] : memref<9x8x8xbf16, #tpu.memory_space<vmem>>, vector<1x8x8xbf16>
    %119 = vector.shape_cast %118 : vector<1x8x8xbf16> to vector<8x8xbf16>
    %120 = arith.truncf %117 : vector<8x256xf32> to vector<8x256xbf16>
    %cst_73 = arith.constant dense<0.000000e+00> : vector<8x256xf32>
    %121 = tpu.matmul %119, %120, %cst_73 {dimension_numbers = #tpu.dot_dimension_numbers<[1], [0], [0], [1], [0, 0, 1, 1], [], []>} : vector<8x8xbf16>, vector<8x256xbf16>, vector<8x256xf32> -> vector<8x256xf32>
    %122 = arith.addf %116, %121 : vector<8x256xf32>
    %123 = vector.extract_strided_slice %85 {offsets = [0, 18], sizes = [8, 256], strides = [1, 1]} : vector<8x290xf32> to vector<8x256xf32>
    %124 = vector.broadcast %1 : vector<1x256xf32> to vector<8x256xf32>
    %125 = arith.mulf %123, %124 : vector<8x256xf32>
    %c5_74 = arith.constant 5 : index
    %c0_75 = arith.constant 0 : index
    %c0_76 = arith.constant 0 : index
    %126 = vector.load %arg5[%c5_74, %c0_75, %c0_76] : memref<9x8x8xbf16, #tpu.memory_space<vmem>>, vector<1x8x8xbf16>
    %127 = vector.shape_cast %126 : vector<1x8x8xbf16> to vector<8x8xbf16>
    %128 = arith.truncf %125 : vector<8x256xf32> to vector<8x256xbf16>
    %cst_77 = arith.constant dense<0.000000e+00> : vector<8x256xf32>
    %129 = tpu.matmul %127, %128, %cst_77 {dimension_numbers = #tpu.dot_dimension_numbers<[1], [0], [0], [1], [0, 0, 1, 1], [], []>} : vector<8x8xbf16>, vector<8x256xbf16>, vector<8x256xf32> -> vector<8x256xf32>
    %130 = arith.addf %122, %129 : vector<8x256xf32>
    %131 = vector.extract_strided_slice %85 {offsets = [0, 32], sizes = [8, 256], strides = [1, 1]} : vector<8x290xf32> to vector<8x256xf32>
    %132 = vector.broadcast %0 : vector<1x256xf32> to vector<8x256xf32>
    %133 = arith.mulf %131, %132 : vector<8x256xf32>
    %c6_78 = arith.constant 6 : index
    %c0_79 = arith.constant 0 : index
    %c0_80 = arith.constant 0 : index
    %134 = vector.load %arg5[%c6_78, %c0_79, %c0_80] : memref<9x8x8xbf16, #tpu.memory_space<vmem>>, vector<1x8x8xbf16>
    %135 = vector.shape_cast %134 : vector<1x8x8xbf16> to vector<8x8xbf16>
    %136 = arith.truncf %133 : vector<8x256xf32> to vector<8x256xbf16>
    %cst_81 = arith.constant dense<0.000000e+00> : vector<8x256xf32>
    %137 = tpu.matmul %135, %136, %cst_81 {dimension_numbers = #tpu.dot_dimension_numbers<[1], [0], [0], [1], [0, 0, 1, 1], [], []>} : vector<8x8xbf16>, vector<8x256xbf16>, vector<8x256xf32> -> vector<8x256xf32>
    %138 = arith.addf %130, %137 : vector<8x256xf32>
    %139 = vector.extract_strided_slice %85 {offsets = [0, 33], sizes = [8, 256], strides = [1, 1]} : vector<8x290xf32> to vector<8x256xf32>
    %c7_82 = arith.constant 7 : index
    %c0_83 = arith.constant 0 : index
    %c0_84 = arith.constant 0 : index
    %140 = vector.load %arg5[%c7_82, %c0_83, %c0_84] : memref<9x8x8xbf16, #tpu.memory_space<vmem>>, vector<1x8x8xbf16>
    %141 = vector.shape_cast %140 : vector<1x8x8xbf16> to vector<8x8xbf16>
    %142 = arith.truncf %139 : vector<8x256xf32> to vector<8x256xbf16>
    %cst_85 = arith.constant dense<0.000000e+00> : vector<8x256xf32>
    %143 = tpu.matmul %141, %142, %cst_85 {dimension_numbers = #tpu.dot_dimension_numbers<[1], [0], [0], [1], [0, 0, 1, 1], [], []>} : vector<8x8xbf16>, vector<8x256xbf16>, vector<8x256xf32> -> vector<8x256xf32>
    %144 = arith.addf %138, %143 : vector<8x256xf32>
    %145 = vector.extract_strided_slice %85 {offsets = [0, 34], sizes = [8, 256], strides = [1, 1]} : vector<8x290xf32> to vector<8x256xf32>
    %146 = vector.broadcast %1 : vector<1x256xf32> to vector<8x256xf32>
    %147 = arith.mulf %145, %146 : vector<8x256xf32>
    %c8_86 = arith.constant 8 : index
    %c0_87 = arith.constant 0 : index
    %c0_88 = arith.constant 0 : index
    %148 = vector.load %arg5[%c8_86, %c0_87, %c0_88] : memref<9x8x8xbf16, #tpu.memory_space<vmem>>, vector<1x8x8xbf16>
    %149 = vector.shape_cast %148 : vector<1x8x8xbf16> to vector<8x8xbf16>
    %150 = arith.truncf %147 : vector<8x256xf32> to vector<8x256xbf16>
    %cst_89 = arith.constant dense<0.000000e+00> : vector<8x256xf32>
    %151 = tpu.matmul %149, %150, %cst_89 {dimension_numbers = #tpu.dot_dimension_numbers<[1], [0], [0], [1], [0, 0, 1, 1], [], []>} : vector<8x8xbf16>, vector<8x256xbf16>, vector<8x256xf32> -> vector<8x256xf32>
    %152 = arith.addf %144, %151 : vector<8x256xf32>
    %c0_90 = arith.constant 0 : index
    %c0_91 = arith.constant 0 : index
    %153 = vector.load %arg6[%c0_90, %c0_91] : memref<8x1xf32, #tpu.memory_space<vmem>>, vector<8x1xf32>
    %154 = vector.broadcast %153 : vector<8x1xf32> to vector<8x256xf32>
    %155 = arith.addf %152, %154 : vector<8x256xf32>
    %cst_92 = arith.constant 0.000000e+00 : f32
    %156 = vector.broadcast %cst_92 : f32 to vector<8x256xf32>
    %157 = arith.maximumf %155, %156 : vector<8x256xf32>
    %c0_93 = arith.constant 0 : index
    %c17_94 = arith.constant 17 : index
    %158 = vector.load %arg11[%c0_93, %c17_94] : memref<8x290xf32, #tpu.memory_space<vmem>>, vector<8x256xf32>
    tpu.vector_store %arg11[%c0_93, %c17_94], %157 {strides = array<i32>} : memref<8x290xf32, #tpu.memory_space<vmem>>, vector<8x256xf32>,
    %c0_95 = arith.constant 0 : index
    %c0_96 = arith.constant 0 : index
    %159 = vector.load %arg11[%c0_95, %c0_96] : memref<8x290xf32, #tpu.memory_space<vmem>>, vector<8x290xf32>
    %cst_97 = arith.constant 0.000000e+00 : f32
    %160 = vector.broadcast %cst_97 : f32 to vector<8x256xf32>
    %161 = vector.extract_strided_slice %159 {offsets = [0, 0], sizes = [8, 256], strides = [1, 1]} : vector<8x290xf32> to vector<8x256xf32>
    %162 = vector.broadcast %0 : vector<1x256xf32> to vector<8x256xf32>
    %163 = arith.mulf %161, %162 : vector<8x256xf32>
    %c0_98 = arith.constant 0 : index
    %c0_99 = arith.constant 0 : index
    %c0_100 = arith.constant 0 : index
    %164 = vector.load %arg7[%c0_98, %c0_99, %c0_100] : memref<9x8x8xbf16, #tpu.memory_space<vmem>>, vector<1x8x8xbf16>
    %165 = vector.shape_cast %164 : vector<1x8x8xbf16> to vector<8x8xbf16>
    %166 = arith.truncf %163 : vector<8x256xf32> to vector<8x256xbf16>
    %cst_101 = arith.constant dense<0.000000e+00> : vector<8x256xf32>
    %167 = tpu.matmul %165, %166, %cst_101 {dimension_numbers = #tpu.dot_dimension_numbers<[1], [0], [0], [1], [0, 0, 1, 1], [], []>} : vector<8x8xbf16>, vector<8x256xbf16>, vector<8x256xf32> -> vector<8x256xf32>
    %168 = arith.addf %160, %167 : vector<8x256xf32>
    %169 = vector.extract_strided_slice %159 {offsets = [0, 1], sizes = [8, 256], strides = [1, 1]} : vector<8x290xf32> to vector<8x256xf32>
    %c1_102 = arith.constant 1 : index
    %c0_103 = arith.constant 0 : index
    %c0_104 = arith.constant 0 : index
    %170 = vector.load %arg7[%c1_102, %c0_103, %c0_104] : memref<9x8x8xbf16, #tpu.memory_space<vmem>>, vector<1x8x8xbf16>
    %171 = vector.shape_cast %170 : vector<1x8x8xbf16> to vector<8x8xbf16>
    %172 = arith.truncf %169 : vector<8x256xf32> to vector<8x256xbf16>
    %cst_105 = arith.constant dense<0.000000e+00> : vector<8x256xf32>
    %173 = tpu.matmul %171, %172, %cst_105 {dimension_numbers = #tpu.dot_dimension_numbers<[1], [0], [0], [1], [0, 0, 1, 1], [], []>} : vector<8x8xbf16>, vector<8x256xbf16>, vector<8x256xf32> -> vector<8x256xf32>
    %174 = arith.addf %168, %173 : vector<8x256xf32>
    %175 = vector.extract_strided_slice %159 {offsets = [0, 2], sizes = [8, 256], strides = [1, 1]} : vector<8x290xf32> to vector<8x256xf32>
    %176 = vector.broadcast %1 : vector<1x256xf32> to vector<8x256xf32>
    %177 = arith.mulf %175, %176 : vector<8x256xf32>
    %c2_106 = arith.constant 2 : index
    %c0_107 = arith.constant 0 : index
    %c0_108 = arith.constant 0 : index
    %178 = vector.load %arg7[%c2_106, %c0_107, %c0_108] : memref<9x8x8xbf16, #tpu.memory_space<vmem>>, vector<1x8x8xbf16>
    %179 = vector.shape_cast %178 : vector<1x8x8xbf16> to vector<8x8xbf16>
    %180 = arith.truncf %177 : vector<8x256xf32> to vector<8x256xbf16>
    %cst_109 = arith.constant dense<0.000000e+00> : vector<8x256xf32>
    %181 = tpu.matmul %179, %180, %cst_109 {dimension_numbers = #tpu.dot_dimension_numbers<[1], [0], [0], [1], [0, 0, 1, 1], [], []>} : vector<8x8xbf16>, vector<8x256xbf16>, vector<8x256xf32> -> vector<8x256xf32>
    %182 = arith.addf %174, %181 : vector<8x256xf32>
    %183 = vector.extract_strided_slice %159 {offsets = [0, 16], sizes = [8, 256], strides = [1, 1]} : vector<8x290xf32> to vector<8x256xf32>
    %184 = vector.broadcast %0 : vector<1x256xf32> to vector<8x256xf32>
    %185 = arith.mulf %183, %184 : vector<8x256xf32>
    %c3_110 = arith.constant 3 : index
    %c0_111 = arith.constant 0 : index
    %c0_112 = arith.constant 0 : index
    %186 = vector.load %arg7[%c3_110, %c0_111, %c0_112] : memref<9x8x8xbf16, #tpu.memory_space<vmem>>, vector<1x8x8xbf16>
    %187 = vector.shape_cast %186 : vector<1x8x8xbf16> to vector<8x8xbf16>
    %188 = arith.truncf %185 : vector<8x256xf32> to vector<8x256xbf16>
    %cst_113 = arith.constant dense<0.000000e+00> : vector<8x256xf32>
    %189 = tpu.matmul %187, %188, %cst_113 {dimension_numbers = #tpu.dot_dimension_numbers<[1], [0], [0], [1], [0, 0, 1, 1], [], []>} : vector<8x8xbf16>, vector<8x256xbf16>, vector<8x256xf32> -> vector<8x256xf32>
    %190 = arith.addf %182, %189 : vector<8x256xf32>
    %191 = vector.extract_strided_slice %159 {offsets = [0, 17], sizes = [8, 256], strides = [1, 1]} : vector<8x290xf32> to vector<8x256xf32>
    %c4_114 = arith.constant 4 : index
    %c0_115 = arith.constant 0 : index
    %c0_116 = arith.constant 0 : index
    %192 = vector.load %arg7[%c4_114, %c0_115, %c0_116] : memref<9x8x8xbf16, #tpu.memory_space<vmem>>, vector<1x8x8xbf16>
    %193 = vector.shape_cast %192 : vector<1x8x8xbf16> to vector<8x8xbf16>
    %194 = arith.truncf %191 : vector<8x256xf32> to vector<8x256xbf16>
    %cst_117 = arith.constant dense<0.000000e+00> : vector<8x256xf32>
    %195 = tpu.matmul %193, %194, %cst_117 {dimension_numbers = #tpu.dot_dimension_numbers<[1], [0], [0], [1], [0, 0, 1, 1], [], []>} : vector<8x8xbf16>, vector<8x256xbf16>, vector<8x256xf32> -> vector<8x256xf32>
    %196 = arith.addf %190, %195 : vector<8x256xf32>
    %197 = vector.extract_strided_slice %159 {offsets = [0, 18], sizes = [8, 256], strides = [1, 1]} : vector<8x290xf32> to vector<8x256xf32>
    %198 = vector.broadcast %1 : vector<1x256xf32> to vector<8x256xf32>
    %199 = arith.mulf %197, %198 : vector<8x256xf32>
    %c5_118 = arith.constant 5 : index
    %c0_119 = arith.constant 0 : index
    %c0_120 = arith.constant 0 : index
    %200 = vector.load %arg7[%c5_118, %c0_119, %c0_120] : memref<9x8x8xbf16, #tpu.memory_space<vmem>>, vector<1x8x8xbf16>
    %201 = vector.shape_cast %200 : vector<1x8x8xbf16> to vector<8x8xbf16>
    %202 = arith.truncf %199 : vector<8x256xf32> to vector<8x256xbf16>
    %cst_121 = arith.constant dense<0.000000e+00> : vector<8x256xf32>
    %203 = tpu.matmul %201, %202, %cst_121 {dimension_numbers = #tpu.dot_dimension_numbers<[1], [0], [0], [1], [0, 0, 1, 1], [], []>} : vector<8x8xbf16>, vector<8x256xbf16>, vector<8x256xf32> -> vector<8x256xf32>
    %204 = arith.addf %196, %203 : vector<8x256xf32>
    %205 = vector.extract_strided_slice %159 {offsets = [0, 32], sizes = [8, 256], strides = [1, 1]} : vector<8x290xf32> to vector<8x256xf32>
    %206 = vector.broadcast %0 : vector<1x256xf32> to vector<8x256xf32>
    %207 = arith.mulf %205, %206 : vector<8x256xf32>
    %c6_122 = arith.constant 6 : index
    %c0_123 = arith.constant 0 : index
    %c0_124 = arith.constant 0 : index
    %208 = vector.load %arg7[%c6_122, %c0_123, %c0_124] : memref<9x8x8xbf16, #tpu.memory_space<vmem>>, vector<1x8x8xbf16>
    %209 = vector.shape_cast %208 : vector<1x8x8xbf16> to vector<8x8xbf16>
    %210 = arith.truncf %207 : vector<8x256xf32> to vector<8x256xbf16>
    %cst_125 = arith.constant dense<0.000000e+00> : vector<8x256xf32>
    %211 = tpu.matmul %209, %210, %cst_125 {dimension_numbers = #tpu.dot_dimension_numbers<[1], [0], [0], [1], [0, 0, 1, 1], [], []>} : vector<8x8xbf16>, vector<8x256xbf16>, vector<8x256xf32> -> vector<8x256xf32>
    %212 = arith.addf %204, %211 : vector<8x256xf32>
    %213 = vector.extract_strided_slice %159 {offsets = [0, 33], sizes = [8, 256], strides = [1, 1]} : vector<8x290xf32> to vector<8x256xf32>
    %c7_126 = arith.constant 7 : index
    %c0_127 = arith.constant 0 : index
    %c0_128 = arith.constant 0 : index
    %214 = vector.load %arg7[%c7_126, %c0_127, %c0_128] : memref<9x8x8xbf16, #tpu.memory_space<vmem>>, vector<1x8x8xbf16>
    %215 = vector.shape_cast %214 : vector<1x8x8xbf16> to vector<8x8xbf16>
    %216 = arith.truncf %213 : vector<8x256xf32> to vector<8x256xbf16>
    %cst_129 = arith.constant dense<0.000000e+00> : vector<8x256xf32>
    %217 = tpu.matmul %215, %216, %cst_129 {dimension_numbers = #tpu.dot_dimension_numbers<[1], [0], [0], [1], [0, 0, 1, 1], [], []>} : vector<8x8xbf16>, vector<8x256xbf16>, vector<8x256xf32> -> vector<8x256xf32>
    %218 = arith.addf %212, %217 : vector<8x256xf32>
    %219 = vector.extract_strided_slice %159 {offsets = [0, 34], sizes = [8, 256], strides = [1, 1]} : vector<8x290xf32> to vector<8x256xf32>
    %220 = vector.broadcast %1 : vector<1x256xf32> to vector<8x256xf32>
    %221 = arith.mulf %219, %220 : vector<8x256xf32>
    %c8_130 = arith.constant 8 : index
    %c0_131 = arith.constant 0 : index
    %c0_132 = arith.constant 0 : index
    %222 = vector.load %arg7[%c8_130, %c0_131, %c0_132] : memref<9x8x8xbf16, #tpu.memory_space<vmem>>, vector<1x8x8xbf16>
    %223 = vector.shape_cast %222 : vector<1x8x8xbf16> to vector<8x8xbf16>
    %224 = arith.truncf %221 : vector<8x256xf32> to vector<8x256xbf16>
    %cst_133 = arith.constant dense<0.000000e+00> : vector<8x256xf32>
    %225 = tpu.matmul %223, %224, %cst_133 {dimension_numbers = #tpu.dot_dimension_numbers<[1], [0], [0], [1], [0, 0, 1, 1], [], []>} : vector<8x8xbf16>, vector<8x256xbf16>, vector<8x256xf32> -> vector<8x256xf32>
    %226 = arith.addf %218, %225 : vector<8x256xf32>
    %c0_134 = arith.constant 0 : index
    %c0_135 = arith.constant 0 : index
    %227 = vector.load %arg8[%c0_134, %c0_135] : memref<8x1xf32, #tpu.memory_space<vmem>>, vector<8x1xf32>
    %228 = vector.broadcast %227 : vector<8x1xf32> to vector<8x256xf32>
    %229 = arith.addf %226, %228 : vector<8x256xf32>
    %cst_136 = arith.constant 0.000000e+00 : f32
    %230 = vector.broadcast %cst_136 : f32 to vector<8x256xf32>
    %231 = arith.maximumf %229, %230 : vector<8x256xf32>
    %c0_137 = arith.constant 0 : index
    %c0_138 = arith.constant 0 : index
    %c0_139 = arith.constant 0 : index
    %232 = vector.load %arg9[%c0_137, %c0_138, %c0_139] : memref<1x8x256xf32, #tpu.memory_space<vmem>>, vector<1x8x256xf32>
    %233 = vector.shape_cast %232 : vector<1x8x256xf32> to vector<8x256xf32>
    %234 = vector.shape_cast %231 : vector<8x256xf32> to vector<1x8x256xf32>
    tpu.vector_store %arg9[%c0_137, %c0_138, %c0_139], %234 {strides = array<i32>} : memref<1x8x256xf32, #tpu.memory_space<vmem>>, vector<1x8x256xf32>,
    return
  }
  func.func @transform_0(%arg0: i32) -> (i32, i32, i32) {
    %c0_i32 = arith.constant 0 : i32
    %c0_i32_0 = arith.constant 0 : i32
    %c0_i32_1 = arith.constant 0 : i32
    return %arg0, %c0_i32, %c0_i32_0 : i32, i32, i32
  }
  func.func @transform_1(%arg0: i32) -> (i32, i32) {
    %c0_i32 = arith.constant 0 : i32
    %c0_i32_0 = arith.constant 0 : i32
    %c0_i32_1 = arith.constant 0 : i32
    return %c0_i32, %c0_i32_0 : i32, i32
  }
  func.func @transform_2(%arg0: i32) -> (i32, i32, i32) {
    %c0_i32 = arith.constant 0 : i32
    %c0_i32_0 = arith.constant 0 : i32
    %c0_i32_1 = arith.constant 0 : i32
    %c0_i32_2 = arith.constant 0 : i32
    return %c0_i32, %c0_i32_0, %c0_i32_1 : i32, i32, i32
  }
  func.func @transform_3(%arg0: i32) -> (i32, i32) {
    %c0_i32 = arith.constant 0 : i32
    %c0_i32_0 = arith.constant 0 : i32
    %c0_i32_1 = arith.constant 0 : i32
    return %c0_i32, %c0_i32_0 : i32, i32
  }
  func.func @transform_4(%arg0: i32) -> (i32, i32, i32) {
    %c0_i32 = arith.constant 0 : i32
    %c0_i32_0 = arith.constant 0 : i32
    %c0_i32_1 = arith.constant 0 : i32
    %c0_i32_2 = arith.constant 0 : i32
    return %c0_i32, %c0_i32_0, %c0_i32_1 : i32, i32, i32
  }
  func.func @transform_5(%arg0: i32) -> (i32, i32) {
    %c0_i32 = arith.constant 0 : i32
    %c0_i32_0 = arith.constant 0 : i32
    %c0_i32_1 = arith.constant 0 : i32
    return %c0_i32, %c0_i32_0 : i32, i32
  }
  func.func @transform_6(%arg0: i32) -> (i32, i32, i32) {
    %c0_i32 = arith.constant 0 : i32
    %c0_i32_0 = arith.constant 0 : i32
    %c0_i32_1 = arith.constant 0 : i32
    %c0_i32_2 = arith.constant 0 : i32
    return %c0_i32, %c0_i32_0, %c0_i32_1 : i32, i32, i32
  }
  func.func @transform_7(%arg0: i32) -> (i32, i32) {
    %c0_i32 = arith.constant 0 : i32
    %c0_i32_0 = arith.constant 0 : i32
    %c0_i32_1 = arith.constant 0 : i32
    return %c0_i32, %c0_i32_0 : i32, i32
  }
  func.func @transform_8(%arg0: i32) -> (i32, i32, i32) {
    %c0_i32 = arith.constant 0 : i32
    %c0_i32_0 = arith.constant 0 : i32
    %c0_i32_1 = arith.constant 0 : i32
    return %arg0, %c0_i32, %c0_i32_0 : i32, i32, i32
  }
}

</mosaic_0001>

<bundles_post_ra>
// kernel: tpu_custom_call.1
= control target key start
LH: loop header
LB: loop body
LE: loop exit
PB: predicated region body
PF: predicated region fallthrough
CT: control target
= control target key end

     0   :  { %13 = vsyncpa [#allocation5], 0  ;;  %s3318_s0 = inlined_call_operand.vmem [shape: f32[2,4,256], index: 0, kind: input, shape index: {}]   ;;  %s3319_s1 = inlined_call_operand.vmem [shape: f32[2,256], index: 1, kind: input, shape index: {}]   ;;  %s3320_s2 = inlined_call_operand.vmem [shape: bf16[9,8,4], index: 2, kind: input, shape index: {}]   ;;  %s3321_s3 = inlined_call_operand.vmem [shape: f32[8,1], index: 3, kind: input, shape index: {}]   ;;  %s3322_s4 = inlined_call_operand.vmem [shape: bf16[9,8,8], index: 4, kind: input, shape index: {}]   ;;  %s3323_s5 = inlined_call_operand.vmem [shape: f32[8,1], index: 5, kind: input, shape index: {}]   ;;  %s3324_s6 = inlined_call_operand.vmem [shape: bf16[9,8,8], index: 6, kind: input, shape index: {}]   ;;  %s3325_s7 = inlined_call_operand.vmem [shape: f32[8,1], index: 7, kind: input, shape index: {}]   ;;  %s3326_s8 = inlined_call_operand.hbm [shape: f32[2,8,256], index: 8, kind: output, shape index: {}]  }
   0x1   :  { %15 = vsyncpa [#allocation5 + $0x1], 0  ;;  %s2672_s27 = smov 0   ;;  %s2674_s28 = smov 0  }
   0x2   :  { %s2676_s29 = smov 0   ;;  %s2678_s30 = smov 0  }
   0x3 LB: > { %s2693_s9 = sadd.s32 4294967295, %s2608_s30   ;;  %s2395_s10 = sadd.s32 4294967294, %s2608_s30   ;;  %s2608_s30 = sphi %s2678_s30, %s3350_s30   ;;  %s2604_s29 = sphi %s2676_s29, %s3349_s29   ;;  %s2600_s28 = sphi %s2674_s28, %s3348_s28   ;;  %s2596_s27 = sphi %s2672_s27, %s3347_s27  }
   0x4   : > { %s2697_s11 = sadd.s32 1, %s2608_s30   ;;  %s201_s12 = sadd.s32 1, %s2604_s29 }
   0x5   : > { %s198_s13 = ssub.s32 %s2608_s30, %s2697_s11  ;;  %p211_p0 = scmp.ne.s32.totalorder %s2604_s29, %s2600_s28 }
   0x6   : > { %p199_p1 = scmp.eq.s32.totalorder %s198_s13, 0  ;;  %p212_p2 = scmp.eq.s32.totalorder %s2693_s9, 1 }
   0x7   : > { %p217_p3 = scmp.ne.s32.totalorder %s2600_s28, %s2596_s27  ;;  %p218_p4 = scmp.eq.s32.totalorder %s2395_s10, 1 }
   0x8   : > { %s2708_s14 = scalar_select %p199_p1, %s2604_s29, %s201_s12  }
   0x9   : > { %p2710_p5 = por %p212_p2, %p211_p0  ;;  %p2714_p6 = por %p218_p4, %p217_p3 }
   0xa   : > { %p2398_p7 = scmp.ge.s32.totalorder %s2608_s30, 1  ;;  %p265_p8 = scmp.lt.s32.totalorder %s2608_s30, 3 }
   0xc   : > { %p266_p9 = pnand %p2398_p7, %p265_p8 }
   0xd   : > { %p299_p10 = scmp.lt.s32.totalorder (!%p266_p9), %s2693_s9, 1  ;;  %v329_v0 = vlaneseq (!%p266_p9)  ;;  %vm308_vm0 = vcmask (!%p266_p9), 134144   ;;  %v2610_v2 = vmov (!%p266_p9), 0.0   ;;  %vm310_vm1 = vcmask (!%p266_p9), 273544   ;;  %s2611_s26 = smov (!%p266_p9), 17  }
   0xe   : > { %269 = sbr.rel (%p266_p9) target bundleno = 1564 (0x61c), region = 52  ;;  %309 = vst.msk [vmem:[#allocation2] sm:$0xf] (!%p266_p9), %vm308_vm0, %v2610_v2  ;;  %vm3337_vm2 = vcmask (!%p266_p9), 138240   ;;  %s2612_s10 = smov (!%p266_p9), 16   ;;  %vm321_vm3 = vcmask (!%p266_p9), 1043592  }
   0xf   : > { %v330_v1 = vshrl.u32 (!%p266_p9), %v329_v0, 7  ;;  %v305_v3 = vld [vmem:[%s3319_s1] ss:$2 sm:$0x3] (!%p266_p9)  ;;  %311 = vst.msk [vmem:[#allocation2 + $0x8] sm:$0xf] (!%p266_p9), %vm310_vm1, %v2610_v2 }
  0x10   : > { %v2402_v4 = vld [vmem:[%s3319_s1 + $0x1] ss:$2 sm:$0x3] (!%p266_p9)  ;;  %1019 = vst.msk [vmem:[#allocation3] sm:$0xff] (!%p266_p9), %vm3337_vm2, %v2610_v2  ;;  %s2613_s12 = smov (!%p266_p9), 2   ;;  %s2614_s13 = smov (!%p266_p9), 18  }
  0x11   : > { %v331_v5 = vsub.s32 (!%p266_p9), 0, %v330_v1  ;;  %v335_v6 = vsub.s32 (!%p266_p9), 1, %v330_v1  ;;  %s2616_s18 = smov (!%p266_p9), 34   ;;  %vm322_vm4 = vcmask (!%p266_p9), 1047556   ;;  %vm562_vm6 = vcmask (!%p266_p9), 130048   ;;  %s2617_s19 = smov (!%p266_p9), 111  }
  0x12   : > { %vm323_vm5 = vmor (!%p266_p9), %vm322_vm4, %vm321_vm3  ;;  %s2618_s20 = smov (!%p266_p9), 127   ;;  %vm370_vm7 = vcmask (!%p266_p9), 1041408   ;;  %vm481_vm8 = vcmask (!%p266_p9), 15360   ;;  %vm366_vm9 = vcmask (!%p266_p9), 31744   ;;  %v340_v38 = vld [vmem:[%s3320_s2] sm:$0xf] (!%p266_p9) }
  0x13   : > { %v2736_v8 = vrot.slane (!%p266_p9), %v305_v3, %v331_v5  ;;  %v2738_v9 = vrot.slane (!%p266_p9), %v305_v3, %v335_v6  ;;  %v2740_v10 = vrot.slane (!%p266_p9), %v2402_v4, %v331_v5  ;;  %v2742_v11 = vrot.slane (!%p266_p9), %v2402_v4, %v335_v6  ;;  %s3331_s23 = smov (!%p266_p9), 112   ;;  %s3327_s24 = smov (!%p266_p9), 126  }
  0x14   : > { %v2619_v41 = vmov (!%p266_p9), 0   ;;  %vm787_vm10 = vcmask (!%p266_p9), 261120   ;;  %vm706_vm11 = vcmask (!%p266_p9), 146432   ;;  %s3329_s21 = smov (!%p266_p9), 110   ;;  %vm931_vm12 = vcmask (!%p266_p9), 277504  }
  0x15   : > { %s300_s17 = scalar_select %p299_p10, %s2693_s9, 1  ;;  %v337_v12 = vcombine.low %v2736_v8, %v2738_v9  ;;  %v477_v13 = vcombine.low %v2740_v10, %v2742_v11  ;;  %409 = vmatprep.mubr.bf16.mxu0 %v2619_v41  ;;  %459 = vmatprep.mubr.bf16.mxu1 %v2619_v41  ;;  %vm363_vm13 = vcmask 1039360   ;;  %vm504_vm14 = vcmask 1031168  }
  0x16   : > { %2543 = vset.pattern.permute.xlu0 %v2619_v41  ;;  %2544 = vset.pattern.permute.xlu1 %v2619_v41  ;;  %vm648_vm15 = vcmask 908288   ;;  %vm729_vm1 = vcmask 900096   ;;  %vm810_vm3 = vcmask 785408   ;;  %vm873_vm4 = vcmask 777216  }
  0x17   : > { %s2486_s22 = sshll.u32 %s300_s17, 3  ;;  %559 = vrot.lane.b32.xlu1 %v337_v12, %s2612_s10  ;;  %s2615_s17 = smov 32  }
  0x18   : > { %s303_s25 = scalar_lea.vmem %s3318_s0, %s2486_s22  ;;  %s3335_s22 = smov 95  }
  0x19   : > { %v312_v7 = vld [vmem:[%s303_s25] sm:$0xff]  ;;  %s2622_s25 = smov 96  }
  0x1a   : > { %314 = vrot.lane.b32.xlu0 %v312_v7, %s2611_s26 }
  0x1b   : > { %703 = vrot.lane.b32.xlu1 %v477_v13, %s2614_s13 }
  0x1e   : > { %478 = vrot.lane.b32.xlu0 %v477_v13, %s2613_s12 }
  0x1f   : > { %928 = vrot.lane.b32.xlu1 %v477_v13, %s2616_s18 }
  0x22   : > { %784 = vrot.lane.b32.xlu0 %v337_v12, %s2615_s17 }
  0x89   : > { %v560_v18 = vpop.permute.xlu1 %559 }
  0x8a   : > { %v561_v20 = vrot.slane %v560_v18, 4 }
  0x8c   : > { %v315_v14 = vpop.permute.xlu0 %314  ;;  %v563_v28 = vsel %vm562_vm6, %v561_v20, %v560_v18 }
  0x8d   : > { %v316_v15 = vrot.slane %v315_v14, 4  ;;  %v704_v42 = vpop.permute.xlu1 %703 }
  0x8e   : > { %v705_v46 = vrot.slane %v704_v42, 4 }
  0x8f   : > { %v318_v16 = vsel %vm3337_vm2, %v316_v15, %v315_v14  ;;  %325 = vst.msk [vmem:[#allocation2 + $0x8] sm:$0xf] %vm308_vm0, %v316_v15  ;;  %vm585_vm0 = vcmask 916480  }
  0x90   : > { %324 = vst.msk [vmem:[#allocation2] sm:$0xff] %vm323_vm5, %v318_v16  ;;  %v479_v21 = vpop.permute.xlu0 %478  ;;  %v707_v51 = vsel %vm706_vm11, %v705_v46, %v704_v42  ;;  %v1009_v16 = vld [vmem:[%s3321_s3] sm:$0xff]  ;;  %vm954_vm5 = vcmask 769024  }
  0x91   : > { %v480_v22 = vrot.slane %v479_v21, 4  ;;  %v929_v60 = vpop.permute.xlu1 %928 }
  0x92   : > { %v930_v0 = vrot.slane %v929_v60, 4 }
  0x93   : > { %v482_v39 = vsel %vm481_vm8, %v480_v22, %v479_v21 }
  0x94   : > { %v785_v32 = vpop.permute.xlu0 %784  ;;  %v932_v4 = vsel %vm931_vm12, %v930_v0, %v929_v60 }
  0x95   : > { %v786_v40 = vrot.slane %v785_v32, 4 }
  0x96   : > { %v2756_v17 = vld [vmem:[#allocation2 + $0x8] sm:$0xf] }
  0x97   : > { %v2758_v19 = vld [vmem:[#allocation2] sm:$0xff]  ;;  %v2762_v23 = vpack.c.bf16 %v2756_v17, %v2756_v17  ;;  %v567_v25 = vmul.f32 %v561_v20, %v2756_v17  ;;  %v486_v29 = vmul.f32 %v480_v22, %v2756_v17  ;;  %v788_v47 = vsel %vm787_vm10, %v786_v40, %v785_v32 }
  0x98   : > { %v339_v24 = vmul.f32 %v337_v12, %v2758_v19  ;;  %v2774_v30 = vpack.c.bf16 %v2758_v19, %v2758_v19  ;;  %v566_v33 = vmul.f32 %v563_v28, %v2758_v19  ;;  %v349_v37 = vcombine.high %v2758_v19, %v2758_v19 }
  0x99   : > { %646 = vrot.lane.b32.xlu1 %v2762_v23, %s2617_s19  ;;  %361 = vrot.lane.b32.xlu0 %v2762_v23, %s2618_s20  ;;  %v575_v35 = vpack.c.bf16 %v567_v25, %v567_v25  ;;  %v494_v36 = vpack.c.bf16 %v486_v29, %v486_v29  ;;  %v485_v43 = vmul.f32 %v482_v39, %v2758_v19 }
  0x9a   : > { %v342_v26 = vcombine.high %v339_v24, %v339_v24  ;;  %v344_v27 = vpack.c.bf16 %v339_v24, %v339_v24  ;;  %v573_v44 = vpack.c.bf16 %v566_v33, %v566_v33  ;;  %v352_v45 = vpack.c.bf16 %v349_v37, %v349_v37  ;;  %v2408_v37 = vld [vmem:[%s3320_s2 + $0x8] sm:$0xf] }
  0x9b   : > { %v791_v48 = vmul.f32 %v788_v47, %v2758_v19  ;;  %v492_v49 = vpack.c.bf16 %v485_v43, %v485_v43  ;;  %v490_v50 = vcombine.high %v485_v43, %v485_v43  ;;  %v710_v52 = vmul.f32 %v707_v51, %v2758_v19 }
  0x9c   : > { %v345_v31 = vpack.c.bf16 %v342_v26, %v342_v26  ;;  %v422_v34 = vsel %vm370_vm7, %v344_v27, 0  ;;  %v571_v55 = vcombine.high %v566_v33, %v566_v33  ;;  %v711_v56 = vmul.f32 %v705_v46, %v2756_v17 }
  0x9d   : > { %642 = vrot.lane.b32.xlu1 %v2774_v30, %s2617_s19  ;;  %357 = vrot.lane.b32.xlu0 %v2774_v30, %s2618_s20  ;;  %v493_v53 = vpack.c.bf16 %v490_v50, %v490_v50  ;;  %v798_v54 = vpack.c.bf16 %v791_v48, %v791_v48  ;;  %v792_v57 = vmul.f32 %v786_v40, %v2756_v17 }
  0x9e   : > { %2406 = vmatprep.subr.msk.bf16.mxu1 %vm370_vm7, %v345_v31  ;;  %v717_v58 = vpack.c.bf16 %v710_v52, %v710_v52  ;;  %v574_v59 = vpack.c.bf16 %v571_v55, %v571_v55  ;;  %v719_v61 = vpack.c.bf16 %v711_v56, %v711_v56  ;;  %v715_v63 = vcombine.high %v710_v52, %v710_v52 }
  0x9f   : > { %428 = vmatpush1.bf16.msra.mxu1 %v422_v34  ;;  %v800_v62 = vpack.c.bf16 %v792_v57, %v792_v57  ;;  %v796_v3 = vcombine.high %v791_v48, %v791_v48  ;;  %v935_v5 = vmul.f32 %v932_v4, %v2758_v19  ;;  %v936_v7 = vmul.f32 %v930_v0, %v2756_v17  ;;  %v2414_v48 = vld [vmem:[%s3320_s2 + $0x10] sm:$0xf] }
  0xa0   : > { %v718_v1 = vpack.c.bf16 %v715_v63, %v715_v63 }
  0xa1   : > { %583 = vrot.lane.b32.xlu0 %v575_v35, %s3331_s23  ;;  %502 = vrot.lane.b32.xlu1 %v494_v36, %s3327_s24  ;;  %v799_v6 = vpack.c.bf16 %v796_v3, %v796_v3  ;;  %v942_v12 = vpack.c.bf16 %v935_v5, %v935_v5  ;;  %v940_v13 = vcombine.high %v935_v5, %v935_v5  ;;  %v2423_v3 = vld [vmem:[%s3320_s2 + $0x1c] sm:$0xf] }
  0xa2   : > { %2407 = vmatmul.mubr.msk.bf16.vlgmr.msra.gmra.mrb[0].mxu1 %vm366_vm9, %v340_v38  ;;  %v944_v14 = vpack.c.bf16 %v936_v7, %v936_v7 }
  0xa3   : > { %629 = vmatprep.mubr.bf16.mxu1 %v2619_v41  ;;  %v943_v15 = vpack.c.bf16 %v940_v13, %v940_v13  ;;  %v2426_v13 = vld [vmem:[%s3320_s2 + $0x20] sm:$0xf] }
  0xa5   : > { %579 = vrot.lane.b32.xlu0 %v573_v44, %s3331_s23  ;;  %359 = vrot.lane.b32.xlu1 %v352_v45, %s2618_s20 }
  0xa9   : > { %644 = vrot.lane.b32.xlu0 %v352_v45, %s2617_s19  ;;  %498 = vrot.lane.b32.xlu1 %v492_v49, %s3327_s24 }
  0xad   : > { %500 = vrot.lane.b32.xlu0 %v493_v53, %s3327_s24  ;;  %804 = vrot.lane.b32.xlu1 %v798_v54, %s2622_s25  ;;  %s3333_s24 = smov 94   ;;  %v2417_v54 = vld [vmem:[%s3320_s2 + $0x14] sm:$0xf] }
  0xb1   : > { %723 = vrot.lane.b32.xlu0 %v717_v58, %s3329_s21  ;;  %581 = vrot.lane.b32.xlu1 %v574_v59, %s3331_s23  ;;  %s3343_s23 = smov 95  }
  0xb5   : > { %727 = vrot.lane.b32.xlu0 %v719_v61, %s3329_s21  ;;  %808 = vrot.lane.b32.xlu1 %v800_v62, %s2622_s25  ;;  %v2420_v61 = vld [vmem:[%s3320_s2 + $0x18] sm:$0xf] }
  0xb9   : > { %867 = vrot.lane.b32.xlu0 %v2774_v30, %s3335_s22  ;;  %725 = vrot.lane.b32.xlu1 %v718_v1, %s3329_s21  ;;  %s3344_s21 = smov 94  }
  0xbd   : > { %869 = vrot.lane.b32.xlu1 %v352_v45, %s3335_s22  ;;  %806 = vrot.lane.b32.xlu0 %v799_v6, %s2622_s25  ;;  %v2411_v45 = vld [vmem:[%s3320_s2 + $0xc] sm:$0xf] }
  0xc1   : > { %948 = vrot.lane.b32.xlu1 %v942_v12, %s3333_s24  ;;  %871 = vrot.lane.b32.xlu0 %v2762_v23, %s3335_s22 }
  0xc5   : > { %952 = vrot.lane.b32.xlu1 %v944_v14, %s3333_s24  ;;  %950 = vrot.lane.b32.xlu0 %v943_v15, %s3333_s24 }
  0xc9   : > { %1012 = vperm.xlu0 %2543, %v1009_v16  }
  0xcd   : > { %1164 = vrot.lane.b32.xlu0 %v2740_v10, %s2613_s12 }
  0xd1   : > { %1243 = vrot.lane.b32.xlu0 %v2736_v8, %s2612_s10 }
  0xd5   : > { %1384 = vrot.lane.b32.xlu0 %v2740_v10, %s2614_s13 }
  0xd9   : > { %1463 = vrot.lane.b32.xlu0 %v2736_v8, %s2615_s17 }
  0xdd   : > { %1604 = vrot.lane.b32.xlu0 %v2740_v10, %s2616_s18  ;;  %v2403_v10 = vld [vmem:[%s3320_s2 + $0x4] sm:$0xf] }
 0x10b   : > { %v647_v17 = vpop.permute.xlu1 %646  ;;  %v362_v18 = vpop.permute.xlu0 %361 }
 0x10f   : > { %v643_v19 = vpop.permute.xlu1 %642  ;;  %v358_v20 = vpop.permute.xlu0 %357 }
 0x113   : > { %v503_v21 = vpop.permute.xlu1 %502  ;;  %v584_v22 = vpop.permute.xlu0 %583 }
 0x117   : > { %v360_v23 = vpop.permute.xlu1 %359  ;;  %v580_v24 = vpop.permute.xlu0 %579 }
 0x118   : > { %v365_v25 = vsel %vm363_vm13, %v360_v23, %v362_v18  ;;  %v364_v26 = vsel %vm363_vm13, %v358_v20, %v360_v23 }
 0x119   : > { %2404 = vmatprep.subr.msk.bf16.mxu0 %vm370_vm7, %v365_v25  ;;  %v372_v27 = vsel %vm370_vm7, %v364_v26, 0 }
 0x11a   : > { %378 = vmatpush1.bf16.msra.mxu0 %v372_v27 }
 0x11b   : > { %v499_v28 = vpop.permute.xlu1 %498  ;;  %v645_v29 = vpop.permute.xlu0 %644 }
 0x11c   : > { %v649_v35 = vsel %vm648_vm15, %v643_v19, %v645_v29  ;;  %v650_v36 = vsel %vm648_vm15, %v645_v29, %v647_v17 }
 0x11d   : > { %2405 = vmatmul.mubr.msk.bf16.vlgmr.msra.gmra.mrb[0].mxu0 %vm366_vm9, %v2403_v10  ;;  %v655_v43 = vsel %vm370_vm7, %v649_v35, 0 }
 0x11e   : > { %548 = vmatprep.mubr.bf16.mxu0 %v2619_v41 }
 0x11f   : > { %v805_v30 = vpop.permute.xlu1 %804  ;;  %v501_v31 = vpop.permute.xlu0 %500 }
 0x120   : > { %v505_v32 = vsel %vm504_vm14, %v499_v28, %v501_v31  ;;  %v506_v33 = vsel %vm504_vm14, %v501_v31, %v503_v21 }
 0x121   : > { %v511_v34 = vsel %vm370_vm7, %v505_v32, 0  ;;  %2409 = vmatprep.subr.msk.bf16.mxu0 %vm370_vm7, %v506_v33 }
 0x122   : > { %517 = vmatpush1.bf16.msra.mxu0 %v511_v34 }
 0x123   : > { %v582_v38 = vpop.permute.xlu1 %581  ;;  %2415 = vmatprep.subr.msk.bf16.mxu0 %vm370_vm7, %v650_v36  ;;  %v724_v39 = vpop.permute.xlu0 %723 }
 0x124   : > { %v586_v40 = vsel %vm585_vm0, %v580_v24, %v582_v38  ;;  %v587_v42 = vsel %vm585_vm0, %v582_v38, %v584_v22 }
 0x125   : > { %v592_v44 = vsel %vm370_vm7, %v586_v40, 0  ;;  %2410 = vmatmul.mubr.msk.bf16.vlgmr.msra.gmra.mrb[4].mxu0 %vm366_vm9, %v2408_v37  ;;  %2412 = vmatprep.subr.msk.bf16.mxu1 %vm370_vm7, %v587_v42 }
 0x126   : > { %598 = vmatpush1.bf16.msra.mxu1 %v592_v44  ;;  %661 = vmatpush1.bf16.msra.mxu0 %v655_v43 }
 0x127   : > { %v809_v46 = vpop.permute.xlu1 %808  ;;  %v728_v47 = vpop.permute.xlu0 %727  ;;  %692 = vmatprep.mubr.bf16.mxu0 %v2619_v41 }
 0x129   : > { %2413 = vmatmul.mubr.msk.bf16.vlgmr.msra.gmra.mrb[4].mxu1 %vm366_vm9, %v2411_v45 }
 0x12a   : > { %773 = vmatprep.mubr.bf16.mxu1 %v2619_v41 }
 0x12b   : > { %v726_v49 = vpop.permute.xlu1 %725  ;;  %v868_v50 = vpop.permute.xlu0 %867 }
 0x12c   : > { %v730_v51 = vsel %vm729_vm1, %v724_v39, %v726_v49  ;;  %v731_v52 = vsel %vm729_vm1, %v726_v49, %v728_v47 }
 0x12d   : > { %v736_v53 = vsel %vm370_vm7, %v730_v51, 0  ;;  %2416 = vmatmul.mubr.msk.bf16.vlgmr.msra.gmra.mrb[8].mxu0 %vm366_vm9, %v2414_v48  ;;  %2418 = vmatprep.subr.msk.bf16.mxu1 %vm370_vm7, %v731_v52 }
 0x12e   : > { %742 = vmatpush1.bf16.msra.mxu1 %v736_v53  ;;  %854 = vmatprep.mubr.bf16.mxu0 %v2619_v41 }
 0x12f   : > { %v870_v55 = vpop.permute.xlu1 %869  ;;  %v807_v56 = vpop.permute.xlu0 %806 }
 0x130   : > { %v811_v57 = vsel %vm810_vm3, %v805_v30, %v807_v56  ;;  %v812_v58 = vsel %vm810_vm3, %v807_v56, %v809_v46  ;;  %v874_v60 = vsel %vm873_vm4, %v868_v50, %v870_v55 }
 0x131   : > { %v817_v59 = vsel %vm370_vm7, %v811_v57, 0  ;;  %2419 = vmatmul.mubr.msk.bf16.vlgmr.msra.gmra.mrb[8].mxu1 %vm366_vm9, %v2417_v54  ;;  %2421 = vmatprep.subr.msk.bf16.mxu0 %vm370_vm7, %v812_v58  ;;  %v880_v1 = vsel %vm370_vm7, %v874_v60, 0 }
 0x132   : > { %823 = vmatpush1.bf16.msra.mxu0 %v817_v59  ;;  %917 = vmatprep.mubr.bf16.mxu1 %v2619_v41 }
 0x133   : > { %v949_v62 = vpop.permute.xlu1 %948  ;;  %v872_v63 = vpop.permute.xlu0 %871 }
 0x134   : > { %v875_v0 = vsel %vm873_vm4, %v870_v55, %v872_v63 }
 0x135   : > { %2422 = vmatmul.mubr.msk.bf16.vlgmr.msra.gmra.mrb[12].mxu0 %vm366_vm9, %v2420_v61  ;;  %2424 = vmatprep.subr.msk.bf16.mxu1 %vm370_vm7, %v875_v0 }
 0x136   : > { %886 = vmatpush1.bf16.msra.mxu1 %v880_v1  ;;  %998 = vmatprep.mubr.bf16.mxu0 %v2619_v41 }
 0x137   : > { %v953_v4 = vpop.permute.xlu1 %952  ;;  %v951_v5 = vpop.permute.xlu0 %950 }
 0x138   : > { %v955_v6 = vsel %vm954_vm5, %v949_v62, %v951_v5  ;;  %v956_v7 = vsel %vm954_vm5, %v951_v5, %v953_v4 }
 0x139   : > { %v961_v12 = vsel %vm370_vm7, %v955_v6, 0  ;;  %2425 = vmatmul.mubr.msk.bf16.vlgmr.msra.gmra.mrb[12].mxu1 %vm366_vm9, %v2423_v3  ;;  %2427 = vmatprep.subr.msk.bf16.mxu0 %vm370_vm7, %v956_v7  ;;  %vm1020_vm7 = vcmask 277640  }
 0x13a   : > { %967 = vmatpush1.bf16.msra.mxu0 %v961_v12  ;;  %1105 = vmatprep.mubr.bf16.mxu1 %v2619_v41  ;;  %1021 = vst.msk [vmem:[#allocation3 + $0x10] sm:$0xff] %vm1020_vm7, %v2610_v2  ;;  %vm1066_vm7 = vcmask 1043456  }
 0x13d   : > { %2428 = vmatmul.mubr.msk.bf16.vlgmr.msra.gmra.mrb[16].mxu0 %vm366_vm9, %v2426_v13  ;;  %vm1032_vm9 = vcmask 1047688  }
 0x13e   : > { %1155 = vmatprep.mubr.bf16.mxu0 %v2619_v41 }
 0x148   : > { %v1013_v61 = vpop.permute.xlu0 %1012 }
 0x175   : > { %v461_v14 = vpop.f32.mrb[0].mxu1 }
 0x176   : > { %v463_v15 = vpop.f32.mrb[1].mxu1 }
 0x177   : > { %v465_v16 = vpop.f32.mrb[2].mxu1 }
 0x178   : > { %v466_v17 = vpop.f32.mrb[3].mxu1 }
 0x1f0   : > { %v411_v18 = vpop.f32.mrb[0].mxu0 }
 0x1f1   : > { %v462_v19 = vadd.f32 %v461_v14, %v411_v18  ;;  %v413_v20 = vpop.f32.mrb[1].mxu0 }
 0x1f2   : > { %v464_v21 = vadd.f32 %v463_v15, %v413_v20  ;;  %v415_v22 = vpop.f32.mrb[2].mxu0  ;;  %v2932_v15 = vpop.permute.xlu0 %1164 }
 0x1f3   : > { %v416_v23 = vpop.f32.mrb[3].mxu0 }
 0x1f8   : > { %v550_v24 = vpop.f32.mrb[4].mxu0 }
 0x1f9   : > { %v557_v25 = vadd.f32 %v550_v24, %v462_v19  ;;  %v552_v26 = vpop.f32.mrb[5].mxu0 }
 0x1fa   : > { %v558_v27 = vadd.f32 %v552_v26, %v464_v21  ;;  %v554_v10 = vpop.f32.mrb[6].mxu0  ;;  %v2949_v21 = vpop.permute.xlu0 %1243  ;;  %v1043_v26 = vld [vmem:[%s3322_s4] sm:$0xf] }
 0x1fb   : > { %v555_v28 = vpop.f32.mrb[7].mxu0 }
 0x1fc   : > { %v631_v29 = vpop.f32.mrb[4].mxu1 }
 0x1fd   : > { %v638_v30 = vadd.f32 %v631_v29, %v557_v25  ;;  %v633_v31 = vpop.f32.mrb[5].mxu1 }
 0x1fe   : > { %v639_v32 = vadd.f32 %v633_v31, %v558_v27  ;;  %v635_v33 = vpop.f32.mrb[6].mxu1  ;;  %v2972_v29 = vpop.permute.xlu0 %1384 }
 0x1ff   : > { %v636_v34 = vpop.f32.mrb[7].mxu1 }
 0x200   : > { %v694_v35 = vpop.f32.mrb[8].mxu0 }
 0x201   : > { %v701_v36 = vadd.f32 %v694_v35, %v638_v30  ;;  %v696_v37 = vpop.f32.mrb[9].mxu0 }
 0x202   : > { %v702_v38 = vadd.f32 %v696_v37, %v639_v32  ;;  %v698_v39 = vpop.f32.mrb[10].mxu0  ;;  %v2990_v35 = vpop.permute.xlu0 %1463 }
 0x203   : > { %v699_v40 = vpop.f32.mrb[11].mxu0 }
 0x204   : > { %v775_v42 = vpop.f32.mrb[8].mxu1 }
 0x205   : > { %v782_v43 = vadd.f32 %v775_v42, %v701_v36  ;;  %v777_v44 = vpop.f32.mrb[9].mxu1 }
 0x206   : > { %v783_v45 = vadd.f32 %v777_v44, %v702_v38  ;;  %v779_v46 = vpop.f32.mrb[10].mxu1 }
 0x207   : > { %v780_v47 = vpop.f32.mrb[11].mxu1 }
 0x208   : > { %v856_v48 = vpop.f32.mrb[12].mxu0 }
 0x209   : > { %v863_v49 = vadd.f32 %v856_v48, %v782_v43  ;;  %v858_v50 = vpop.f32.mrb[13].mxu0 }
 0x20a   : > { %v864_v51 = vadd.f32 %v858_v50, %v783_v45  ;;  %v860_v52 = vpop.f32.mrb[14].mxu0 }
 0x20b   : > { %v861_v53 = vpop.f32.mrb[15].mxu0 }
 0x20c   : > { %v919_v54 = vpop.f32.mrb[12].mxu1 }
 0x20d   : > { %v926_v55 = vadd.f32 %v919_v54, %v863_v49  ;;  %v921_v56 = vpop.f32.mrb[13].mxu1 }
 0x20e   : > { %v927_v57 = vadd.f32 %v921_v56, %v864_v51  ;;  %v923_v58 = vpop.f32.mrb[14].mxu1 }
 0x20f   : > { %v924_v59 = vpop.f32.mrb[15].mxu1 }
 0x210   : > { %v1000_v60 = vpop.f32.mrb[16].mxu0  ;;  %v3035_v59 = vpop.permute.xlu0 %1604 }
 0x211   : > { %v1007_v62 = vadd.f32 %v1000_v60, %v926_v55  ;;  %v1002_v63 = vpop.f32.mrb[17].mxu0 }
 0x212   : > { %v1008_v0 = vadd.f32 %v1002_v63, %v927_v57  ;;  %v1004_v1 = vpop.f32.mrb[18].mxu0 }
 0x213   : > { %v1015_v3 = vadd.f32 %v1013_v61, %v1007_v62  ;;  %v1005_v4 = vpop.f32.mrb[19].mxu0 }
 0x214   : > { %v1016_v5 = vadd.f32 %v1013_v61, %v1008_v0 }
 0x215   : > { %v1017_v6 = vmax.f32 %v1015_v3, 0.0 }
 0x216   : > { %v1018_v7 = vmax.f32 %v1016_v5, 0.0 }
 0x217   : > { %1024 = vrot.lane.b32.xlu1 %v1017_v6, %s2611_s26  ;;  %v1683_v6 = vld [vmem:[%s3323_s5] sm:$0xff] }
 0x21b   : > { %1026 = vrot.lane.b32.xlu1 %v1018_v7, %s2611_s26 }
 0x21f   : > { %1166 = vrot.lane.b32.xlu1 %v2742_v11, %s2613_s12 }
 0x223   : > { %1245 = vrot.lane.b32.xlu1 %v2738_v9, %s2612_s10 }
 0x227   : > { %1386 = vrot.lane.b32.xlu1 %v2742_v11, %s2614_s13  ;;  %s3340_s13 = smov 112  }
 0x22b   : > { %1465 = vrot.lane.b32.xlu1 %v2738_v9, %s2615_s17  ;;  %s3341_s17 = smov 126  }
 0x22f   : > { %1606 = vrot.lane.b32.xlu1 %v2742_v11, %s2616_s18  ;;  %s3342_s18 = smov 110  }
 0x289   : > { %v1025_v2 = vpop.permute.xlu1 %1024 }
 0x28a   : > { %1033 = vst.msk [vmem:[#allocation3] sm:$0xff] %vm1032_vm9, %v1025_v2 }
 0x28d   : > { %v1027_v12 = vpop.permute.xlu1 %1026 }
 0x28e   : > { %v2927_v13 = vsel %vm3337_vm2, %v1025_v2, %v1027_v12  ;;  %1035 = vst.msk [vmem:[#allocation3 + $0x10] sm:$0xff] %vm3337_vm2, %v1027_v12  ;;  %vm1062_vm2 = vcmask 64512  }
 0x28f   : > { %v1042_v14 = vmul.f32 %v2927_v13, %v2738_v9  ;;  %v1049_v27 = vpack.c.bf16 %v2927_v13, %v2927_v13 }
 0x291   : > { %v2934_v16 = vld [vmem:[#allocation3] sm:$0xff]  ;;  %v1045_v17 = vpack.c.bf16 %v1042_v14, %v1042_v14  ;;  %v2951_v22 = vpop.permute.xlu1 %1166 }
 0x292   : > { %v2938_v11 = vpack.c.bf16 %v2934_v16, %v2934_v16  ;;  %v1041_v18 = vmul.f32 %v2934_v16, %v2736_v8  ;;  %v1251_v25 = vmul.f32 %v2949_v21, %v2934_v16  ;;  %v1172_v28 = vmul.f32 %v2932_v15, %v2934_v16 }
 0x293   : > { %2432 = vmatprep.subr.msk.bf16.mxu0 %vm1066_vm7, %v1045_v17  ;;  %v2986_v34 = vsel %vm481_vm8, %v2932_v15, %v2951_v22  ;;  %v1471_v37 = vmul.f32 %v2990_v35, %v2934_v16  ;;  %v1392_v43 = vmul.f32 %v2972_v29, %v2934_v16  ;;  %v1612_v61 = vmul.f32 %v3035_v59, %v2934_v16 }
 0x294   : > { %1324 = vrot.lane.b32.xlu1 %v2938_v11, %s2617_s19  ;;  %1054 = vrot.lane.b32.xlu0 %v2938_v11, %s2618_s20  ;;  %v1044_v20 = vpack.c.bf16 %v1041_v18, %v1041_v18  ;;  %v1256_v10 = vpack.c.bf16 %v1251_v25, %v1251_v25  ;;  %v1177_v33 = vpack.c.bf16 %v1172_v28, %v1172_v28 }
 0x295   : > { %v2943_v19 = vld [vmem:[#allocation3 + $0x10] sm:$0xff]  ;;  %v2974_v30 = vpop.permute.xlu1 %1245  ;;  %v1173_v40 = vmul.f32 %v2986_v34, %v2927_v13  ;;  %v1476_v45 = vpack.c.bf16 %v1471_v37, %v1471_v37  ;;  %v1397_v50 = vpack.c.bf16 %v1392_v43, %v1392_v43  ;;  %v1617_v1 = vpack.c.bf16 %v1612_v61, %v1612_v61  ;;  %v2434_v37 = vld [vmem:[%s3322_s4 + $0x8] sm:$0xf] }
 0x296   : > { %v2955_v23 = vpack.c.bf16 %v2943_v19, %v2943_v19  ;;  %v1118_v24 = vsel %vm1066_vm7, %v1044_v20, 0  ;;  %v1174_v31 = vmul.f32 %v2951_v22, %v2943_v19  ;;  %v1253_v32 = vmul.f32 %v2974_v30, %v2943_v19 }
 0x297   : > { %1124 = vmatpush1.bf16.msra.mxu0 %v1118_v24  ;;  %v3001_v42 = vsel %vm562_vm6, %v2949_v21, %v2974_v30  ;;  %v1178_v44 = vpack.c.bf16 %v1173_v40, %v1173_v40  ;;  %vm3345_vm6 = vcmask 138240  }
 0x298   : > { %1328 = vrot.lane.b32.xlu1 %v2955_v23, %s2617_s19  ;;  %1058 = vrot.lane.b32.xlu0 %v2955_v23, %s2618_s20  ;;  %v1179_v38 = vpack.c.bf16 %v1174_v31, %v1174_v31  ;;  %v1258_v39 = vpack.c.bf16 %v1253_v32, %v1253_v32  ;;  %v1252_v46 = vmul.f32 %v3001_v42, %v2927_v13  ;;  %vm3346_vm8 = vmmov %vm3345_vm6 }
 0x299   : > { %v2992_v36 = vpop.permute.xlu1 %1386 }
 0x29a   : > { %2433 = vmatmul.mubr.msk.bf16.vlgmr.msra.gmra.mrb[20].mxu0 %vm1062_vm2, %v1043_v26  ;;  %v1394_v48 = vmul.f32 %v2992_v36, %v2943_v19  ;;  %v1257_v51 = vpack.c.bf16 %v1252_v46, %v1252_v46  ;;  %v3020_v52 = vsel %vm706_vm11, %v2972_v29, %v2992_v36  ;;  %v2437_v46 = vld [vmem:[%s3322_s4 + $0xc] sm:$0xf] }
 0x29b   : > { %1311 = vmatprep.mubr.bf16.mxu0 %v2619_v41  ;;  %v1393_v55 = vmul.f32 %v3020_v52, %v2927_v13 }
 0x29c   : > { %1056 = vrot.lane.b32.xlu1 %v1049_v27, %s2618_s20  ;;  %1262 = vrot.lane.b32.xlu0 %v1256_v10, %s3340_s13  ;;  %v1399_v53 = vpack.c.bf16 %v1394_v48, %v1394_v48 }
 0x29d   : > { %v3009_v47 = vpop.permute.xlu1 %1465  ;;  %v1398_v57 = vpack.c.bf16 %v1393_v55, %v1393_v55 }
 0x29e   : > { %v1473_v49 = vmul.f32 %v3009_v47, %v2943_v19  ;;  %v3029_v56 = vsel %vm787_vm10, %v2990_v35, %v3009_v47 }
 0x29f   : > { %v1472_v58 = vmul.f32 %v3029_v56, %v2927_v13 }
 0x2a0   : > { %1183 = vrot.lane.b32.xlu1 %v1177_v33, %s3341_s17  ;;  %1326 = vrot.lane.b32.xlu0 %v1049_v27, %s2617_s19  ;;  %v1478_v54 = vpack.c.bf16 %v1473_v49, %v1473_v49 }
 0x2a1   : > { %v3037_v60 = vpop.permute.xlu1 %1606  ;;  %v1477_v62 = vpack.c.bf16 %v1472_v58, %v1472_v58  ;;  %v2443_v58 = vld [vmem:[%s3322_s4 + $0x14] sm:$0xf] }
 0x2a2   : > { %v3047_v63 = vsel %vm931_vm12, %v3035_v59, %v3037_v60  ;;  %v1614_v0 = vmul.f32 %v3037_v60, %v2943_v19  ;;  %v2429_v19 = vld [vmem:[%s3322_s4 + $0x4] sm:$0xf] }
 0x2a3   : > { %v1613_v3 = vmul.f32 %v3047_v63, %v2927_v13 }
 0x2a4   : > { %1187 = vrot.lane.b32.xlu1 %v1179_v38, %s3341_s17  ;;  %1266 = vrot.lane.b32.xlu0 %v1258_v39, %s3340_s13  ;;  %v1619_v4 = vpack.c.bf16 %v1614_v0, %v1614_v0 }
 0x2a5   : > { %v1618_v5 = vpack.c.bf16 %v1613_v3, %v1613_v3 }
 0x2a8   : > { %1185 = vrot.lane.b32.xlu0 %v1178_v44, %s3341_s17  ;;  %1482 = vrot.lane.b32.xlu1 %v1476_v45, %s2622_s25 }
 0x2ac   : > { %1403 = vrot.lane.b32.xlu0 %v1397_v50, %s3342_s18  ;;  %1264 = vrot.lane.b32.xlu1 %v1257_v51, %s3340_s13  ;;  %v2440_v50 = vld [vmem:[%s3322_s4 + $0x10] sm:$0xf] }
 0x2b0   : > { %1407 = vrot.lane.b32.xlu0 %v1399_v53, %s3342_s18  ;;  %1486 = vrot.lane.b32.xlu1 %v1478_v54, %s2622_s25 }
 0x2b4   : > { %1544 = vrot.lane.b32.xlu0 %v2938_v11, %s3343_s23  ;;  %1405 = vrot.lane.b32.xlu1 %v1398_v57, %s3342_s18 }
 0x2b8   : > { %1546 = vrot.lane.b32.xlu1 %v1049_v27, %s3343_s23  ;;  %1484 = vrot.lane.b32.xlu0 %v1477_v62, %s2622_s25 }
 0x2bc   : > { %1548 = vrot.lane.b32.xlu0 %v2955_v23, %s3343_s23  ;;  %1623 = vrot.lane.b32.xlu1 %v1617_v1, %s3344_s21 }
 0x2c0   : > { %1627 = vrot.lane.b32.xlu1 %v1619_v4, %s3344_s21  ;;  %1625 = vrot.lane.b32.xlu0 %v1618_v5, %s3344_s21  ;;  %v2446_v5 = vld [vmem:[%s3322_s4 + $0x18] sm:$0xf] }
 0x2c4   : > { %1686 = vperm.xlu0 %2543, %v1683_v6  }
 0x306   : > { %v1325_v7 = vpop.permute.xlu1 %1324  ;;  %v1055_v2 = vpop.permute.xlu0 %1054 }
 0x30a   : > { %v1329_v12 = vpop.permute.xlu1 %1328  ;;  %v1059_v13 = vpop.permute.xlu0 %1058 }
 0x30e   : > { %v1057_v14 = vpop.permute.xlu1 %1056  ;;  %v1263_v16 = vpop.permute.xlu0 %1262 }
 0x30f   : > { %v1060_v17 = vsel %vm363_vm13, %v1055_v2, %v1057_v14  ;;  %v1061_v11 = vsel %vm363_vm13, %v1057_v14, %v1059_v13  ;;  %v2449_v13 = vld [vmem:[%s3322_s4 + $0x1c] sm:$0xf] }
 0x310   : > { %v1068_v18 = vsel %vm1066_vm7, %v1060_v17, 0  ;;  %2430 = vmatprep.subr.msk.bf16.mxu1 %vm1066_vm7, %v1061_v11 }
 0x311   : > { %1074 = vmatpush1.bf16.msra.mxu1 %v1068_v18 }
 0x312   : > { %v1184_v20 = vpop.permute.xlu1 %1183  ;;  %v1327_v23 = vpop.permute.xlu0 %1326 }
 0x313   : > { %v1330_v32 = vsel %vm648_vm15, %v1325_v7, %v1327_v23  ;;  %v1331_v33 = vsel %vm648_vm15, %v1327_v23, %v1329_v12 }
 0x314   : > { %2431 = vmatmul.mubr.msk.bf16.vlgmr.msra.gmra.mrb[16].mxu1 %vm1062_vm2, %v2429_v19  ;;  %v1336_v44 = vsel %vm1066_vm7, %v1330_v32, 0  ;;  %v2452_v19 = vld [vmem:[%s3322_s4 + $0x20] sm:$0xf] }
 0x315   : > { %1232 = vmatprep.mubr.bf16.mxu1 %v2619_v41 }
 0x316   : > { %v1188_v24 = vpop.permute.xlu1 %1187  ;;  %v1267_v25 = vpop.permute.xlu0 %1266 }
 0x31a   : > { %v1483_v26 = vpop.permute.xlu1 %1482  ;;  %v1186_v27 = vpop.permute.xlu0 %1185 }
 0x31b   : > { %v1189_v10 = vsel %vm504_vm14, %v1184_v20, %v1186_v27  ;;  %v1190_v28 = vsel %vm504_vm14, %v1186_v27, %v1188_v24 }
 0x31c   : > { %v1195_v31 = vsel %vm1066_vm7, %v1189_v10, 0  ;;  %2435 = vmatprep.subr.msk.bf16.mxu1 %vm1066_vm7, %v1190_v28 }
 0x31d   : > { %1201 = vmatpush1.bf16.msra.mxu1 %v1195_v31 }
 0x31e   : > { %v1265_v38 = vpop.permute.xlu1 %1264  ;;  %2441 = vmatprep.subr.msk.bf16.mxu1 %vm1066_vm7, %v1331_v33  ;;  %v1404_v39 = vpop.permute.xlu0 %1403 }
 0x31f   : > { %v1268_v40 = vsel %vm585_vm0, %v1263_v16, %v1265_v38  ;;  %v1269_v43 = vsel %vm585_vm0, %v1265_v38, %v1267_v25 }
 0x320   : > { %v1274_v45 = vsel %vm1066_vm7, %v1268_v40, 0  ;;  %2436 = vmatmul.mubr.msk.bf16.vlgmr.msra.gmra.mrb[20].mxu1 %vm1062_vm2, %v2434_v37  ;;  %2438 = vmatprep.subr.msk.bf16.mxu0 %vm1066_vm7, %v1269_v43 }
 0x321   : > { %1280 = vmatpush1.bf16.msra.mxu0 %v1274_v45  ;;  %1342 = vmatpush1.bf16.msra.mxu1 %v1336_v44 }
 0x322   : > { %v1487_v48 = vpop.permute.xlu1 %1486  ;;  %v1408_v49 = vpop.permute.xlu0 %1407  ;;  %1373 = vmatprep.mubr.bf16.mxu1 %v2619_v41 }
 0x324   : > { %2439 = vmatmul.mubr.msk.bf16.vlgmr.msra.gmra.mrb[24].mxu0 %vm1062_vm2, %v2437_v46 }
 0x325   : > { %1452 = vmatprep.mubr.bf16.mxu0 %v2619_v41 }
 0x326   : > { %v1406_v51 = vpop.permute.xlu1 %1405  ;;  %v1545_v53 = vpop.permute.xlu0 %1544 }
 0x327   : > { %v1409_v54 = vsel %vm729_vm1, %v1404_v39, %v1406_v51  ;;  %v1410_v55 = vsel %vm729_vm1, %v1406_v51, %v1408_v49 }
 0x328   : > { %v1415_v57 = vsel %vm1066_vm7, %v1409_v54, 0  ;;  %2442 = vmatmul.mubr.msk.bf16.vlgmr.msra.gmra.mrb[24].mxu1 %vm1062_vm2, %v2440_v50  ;;  %2444 = vmatprep.subr.msk.bf16.mxu0 %vm1066_vm7, %v1410_v55 }
 0x329   : > { %1421 = vmatpush1.bf16.msra.mxu0 %v1415_v57  ;;  %1531 = vmatprep.mubr.bf16.mxu1 %v2619_v41 }
 0x32a   : > { %v1547_v61 = vpop.permute.xlu1 %1546  ;;  %v1485_v62 = vpop.permute.xlu0 %1484 }
 0x32b   : > { %v1488_v0 = vsel %vm810_vm3, %v1483_v26, %v1485_v62  ;;  %v1489_v1 = vsel %vm810_vm3, %v1485_v62, %v1487_v48  ;;  %v1550_v4 = vsel %vm873_vm4, %v1545_v53, %v1547_v61 }
 0x32c   : > { %v1494_v3 = vsel %vm1066_vm7, %v1488_v0, 0  ;;  %2445 = vmatmul.mubr.msk.bf16.vlgmr.msra.gmra.mrb[28].mxu0 %vm1062_vm2, %v2443_v58  ;;  %2447 = vmatprep.subr.msk.bf16.mxu1 %vm1066_vm7, %v1489_v1  ;;  %v1556_v12 = vsel %vm1066_vm7, %v1550_v4, 0 }
 0x32d   : > { %1500 = vmatpush1.bf16.msra.mxu1 %v1494_v3  ;;  %1593 = vmatprep.mubr.bf16.mxu0 %v2619_v41 }
 0x32e   : > { %v1624_v6 = vpop.permute.xlu1 %1623  ;;  %v1549_v7 = vpop.permute.xlu0 %1548 }
 0x32f   : > { %v1551_v2 = vsel %vm873_vm4, %v1547_v61, %v1549_v7 }
 0x330   : > { %2448 = vmatmul.mubr.msk.bf16.vlgmr.msra.gmra.mrb[28].mxu1 %vm1062_vm2, %v2446_v5  ;;  %2450 = vmatprep.subr.msk.bf16.mxu0 %vm1066_vm7, %v1551_v2 }
 0x331   : > { %1562 = vmatpush1.bf16.msra.mxu0 %v1556_v12  ;;  %1672 = vmatprep.mubr.bf16.mxu1 %v2619_v41 }
 0x332   : > { %v1628_v14 = vpop.permute.xlu1 %1627  ;;  %v1626_v16 = vpop.permute.xlu0 %1625 }
 0x333   : > { %v1629_v17 = vsel %vm954_vm5, %v1624_v6, %v1626_v16  ;;  %v1630_v11 = vsel %vm954_vm5, %v1626_v16, %v1628_v14 }
 0x334   : > { %v1635_v18 = vsel %vm1066_vm7, %v1629_v17, 0  ;;  %2451 = vmatmul.mubr.msk.bf16.vlgmr.msra.gmra.mrb[32].mxu0 %vm1062_vm2, %v2449_v13  ;;  %2453 = vmatprep.subr.msk.bf16.mxu1 %vm1066_vm7, %v1630_v11 }
 0x335   : > { %1641 = vmatpush1.bf16.msra.mxu1 %v1635_v18  ;;  %1771 = vmatprep.mubr.bf16.mxu0 %v2619_v41 }
 0x338   : > { %2454 = vmatmul.mubr.msk.bf16.vlgmr.msra.gmra.mrb[32].mxu1 %vm1062_vm2, %v2452_v19 }
 0x339   : > { %1821 = vmatprep.mubr.bf16.mxu1 %v2619_v41 }
 0x36d   : > { %v1157_v20 = vpop.f32.mrb[20].mxu0 }
 0x36e   : > { %v1159_v23 = vpop.f32.mrb[21].mxu0 }
 0x36f   : > { %v1161_v24 = vpop.f32.mrb[22].mxu0 }
 0x370   : > { %v1162_v25 = vpop.f32.mrb[23].mxu0 }
 0x371   : > { %v1687_v25 = vpop.permute.xlu0 %1686 }
 0x3e7   : > { %v1107_v26 = vpop.f32.mrb[16].mxu1 }
 0x3e8   : > { %v1109_v27 = vpop.f32.mrb[17].mxu1  ;;  %v1158_v10 = vadd.f32 %v1157_v20, %v1107_v26 }
 0x3e9   : > { %v1111_v28 = vpop.f32.mrb[18].mxu1  ;;  %v1160_v31 = vadd.f32 %v1159_v23, %v1109_v27 }
 0x3ea   : > { %v1112_v32 = vpop.f32.mrb[19].mxu1 }
 0x3f3   : > { %v1234_v33 = vpop.f32.mrb[20].mxu1 }
 0x3f4   : > { %v1241_v37 = vadd.f32 %v1234_v33, %v1158_v10  ;;  %v1236_v38 = vpop.f32.mrb[21].mxu1 }
 0x3f5   : > { %v1242_v39 = vadd.f32 %v1236_v38, %v1160_v31  ;;  %v1238_v40 = vpop.f32.mrb[22].mxu1 }
 0x3f6   : > { %v1239_v43 = vpop.f32.mrb[23].mxu1 }
 0x3f7   : > { %v1313_v44 = vpop.f32.mrb[24].mxu0 }
 0x3f8   : > { %v1320_v45 = vadd.f32 %v1313_v44, %v1241_v37  ;;  %v1315_v46 = vpop.f32.mrb[25].mxu0 }
 0x3f9   : > { %v1321_v48 = vadd.f32 %v1315_v46, %v1242_v39  ;;  %v1317_v49 = vpop.f32.mrb[26].mxu0 }
 0x3fa   : > { %v1318_v50 = vpop.f32.mrb[27].mxu0 }
 0x3fb   : > { %v1375_v51 = vpop.f32.mrb[24].mxu1 }
 0x3fc   : > { %v1382_v53 = vadd.f32 %v1375_v51, %v1320_v45  ;;  %v1377_v54 = vpop.f32.mrb[25].mxu1 }
 0x3fd   : > { %v1383_v55 = vadd.f32 %v1377_v54, %v1321_v48  ;;  %v1379_v57 = vpop.f32.mrb[26].mxu1 }
 0x3fe   : > { %v1380_v58 = vpop.f32.mrb[27].mxu1 }
 0x3ff   : > { %v1454_v61 = vpop.f32.mrb[28].mxu0 }
 0x400   : > { %v1461_v62 = vadd.f32 %v1454_v61, %v1382_v53  ;;  %v1456_v0 = vpop.f32.mrb[29].mxu0 }
 0x401   : > { %v1462_v1 = vadd.f32 %v1456_v0, %v1383_v55  ;;  %v1458_v3 = vpop.f32.mrb[30].mxu0  ;;  %v1711_v55 = vld [vmem:[%s3324_s6] sm:$0xf] }
 0x402   : > { %v1459_v4 = vpop.f32.mrb[31].mxu0 }
 0x403   : > { %v1533_v5 = vpop.f32.mrb[28].mxu1 }
 0x404   : > { %v1540_v6 = vadd.f32 %v1533_v5, %v1461_v62  ;;  %v1535_v7 = vpop.f32.mrb[29].mxu1 }
 0x405   : > { %v1541_v2 = vadd.f32 %v1535_v7, %v1462_v1  ;;  %v1537_v12 = vpop.f32.mrb[30].mxu1 }
 0x406   : > { %v1538_v13 = vpop.f32.mrb[31].mxu1 }
 0x407   : > { %v1595_v14 = vpop.f32.mrb[32].mxu0 }
 0x408   : > { %v1602_v16 = vadd.f32 %v1595_v14, %v1540_v6  ;;  %v1597_v17 = vpop.f32.mrb[33].mxu0 }
 0x409   : > { %v1603_v11 = vadd.f32 %v1597_v17, %v1541_v2  ;;  %v1599_v18 = vpop.f32.mrb[34].mxu0 }
 0x40a   : > { %v1600_v19 = vpop.f32.mrb[35].mxu0 }
 0x40b   : > { %v1674_v20 = vpop.f32.mrb[32].mxu1 }
 0x40c   : > { %v1681_v23 = vadd.f32 %v1674_v20, %v1602_v16  ;;  %v1676_v24 = vpop.f32.mrb[33].mxu1 }
 0x40d   : > { %v1682_v26 = vadd.f32 %v1676_v24, %v1603_v11  ;;  %v1678_v27 = vpop.f32.mrb[34].mxu1  ;;  %v2455_v24 = vld [vmem:[%s3324_s6 + $0x4] sm:$0xf] }
 0x40e   : > { %v1689_v10 = vadd.f32 %v1687_v25, %v1681_v23  ;;  %v1679_v28 = vpop.f32.mrb[35].mxu1 }
 0x40f   : > { %v1690_v31 = vadd.f32 %v1687_v25, %v1682_v26 }
 0x410   : > { %v1691_v32 = vmax.f32 %v1689_v10, 0.0 }
 0x411   : > { %v1692_v33 = vmax.f32 %v1690_v31, 0.0 }
 0x412   : > { %1695 = vrot.lane.b32.xlu1 %v1691_v32, %s2611_s26 }
 0x413   : > { %1697 = vrot.lane.b32.xlu0 %v1692_v33, %s2611_s26 }
 0x484   : > { %v1696_v37 = vpop.permute.xlu1 %1695 }
 0x485   : > { %1703 = vst.msk [vmem:[#allocation3] sm:$0xff] %vm1032_vm9, %v1696_v37  ;;  %v1698_v38 = vpop.permute.xlu0 %1697 }
 0x486   : > { %v3139_v39 = vsel %vm3345_vm6, %v1696_v37, %v1698_v38  ;;  %1705 = vst.msk [vmem:[#allocation3 + $0x10] sm:$0xff] %vm3346_vm8, %v1698_v38 }
 0x487   : > { %v1710_v40 = vmul.f32 %v3139_v39, %v2738_v9  ;;  %v1831_v62 = vmul.f32 %v3139_v39, %v2986_v34  ;;  %v2106_v2 = vmul.f32 %v3139_v39, %v3029_v56  ;;  %v2239_v12 = vmul.f32 %v3139_v39, %v3047_v63 }
 0x489   : > { %v1713_v43 = vpack.c.bf16 %v1710_v40, %v1710_v40  ;;  %v1836_v1 = vpack.c.bf16 %v1831_v62, %v1831_v62  ;;  %v2244_v56 = vpack.c.bf16 %v2239_v12, %v2239_v12  ;;  %v2460_v40 = vld [vmem:[%s3324_s6 + $0x8] sm:$0xf] }
 0x48b   : > { %2458 = vmatprep.subr.msk.bf16.mxu1 %vm1066_vm7, %v1713_v43 }
 0x48c   : > { %v1706_v44 = vld [vmem:[#allocation3] sm:$0xff] }
 0x48d   : > { %v1716_v45 = vpack.c.bf16 %v1706_v44, %v1706_v44  ;;  %v1709_v46 = vmul.f32 %v1706_v44, %v2736_v8  ;;  %v1708_v48 = vld [vmem:[#allocation3 + $0x10] sm:$0xff]  ;;  %v1901_v53 = vmul.f32 %v1706_v44, %v2949_v21  ;;  %v1717_v8 = vpack.c.bf16 %v3139_v39, %v3139_v39 }
 0x48e   : > { %v1718_v50 = vpack.c.bf16 %v1708_v48, %v1708_v48  ;;  %v1830_v54 = vmul.f32 %v1706_v44, %v2932_v15  ;;  %v1903_v57 = vmul.f32 %v1708_v48, %v2974_v30  ;;  %v1832_v58 = vmul.f32 %v1708_v48, %v2951_v22 }
 0x48f   : > { %1974 = vrot.lane.b32.xlu0 %v1716_v45, %s2617_s19  ;;  %1722 = vrot.lane.b32.xlu1 %v1716_v45, %s2618_s20  ;;  %v1712_v49 = vpack.c.bf16 %v1709_v46, %v1709_v46  ;;  %v1906_v9 = vpack.c.bf16 %v1901_v53, %v1901_v53  ;;  %v2105_v0 = vmul.f32 %v1706_v44, %v2990_v35 }
 0x490   : > { %v1835_v21 = vpack.c.bf16 %v1830_v54, %v1830_v54  ;;  %v1908_v15 = vpack.c.bf16 %v1903_v57, %v1903_v57  ;;  %v1837_v61 = vpack.c.bf16 %v1832_v58, %v1832_v58  ;;  %v2034_v30 = vmul.f32 %v1706_v44, %v2972_v29  ;;  %v2469_v58 = vld [vmem:[%s3324_s6 + $0x14] sm:$0xf] }
 0x491   : > { %v1784_v51 = vsel %vm1066_vm7, %v1712_v49, 0  ;;  %v2110_v3 = vpack.c.bf16 %v2105_v0, %v2105_v0  ;;  %v1902_v22 = vmul.f32 %v3139_v39, %v3001_v42  ;;  %v2036_v34 = vmul.f32 %v1708_v48, %v2992_v36 }
 0x492   : > { %1790 = vmatpush1.bf16.msra.mxu1 %v1784_v51  ;;  %v2039_v4 = vpack.c.bf16 %v2034_v30, %v2034_v30  ;;  %v2107_v35 = vmul.f32 %v1708_v48, %v3009_v47  ;;  %v2035_v29 = vmul.f32 %v3139_v39, %v3020_v52  ;;  %v2111_v36 = vpack.c.bf16 %v2106_v2, %v2106_v2  ;;  %v2472_v30 = vld [vmem:[%s3324_s6 + $0x18] sm:$0xf] }
 0x493   : > { %1978 = vrot.lane.b32.xlu0 %v1718_v50, %s2617_s19  ;;  %1726 = vrot.lane.b32.xlu1 %v1718_v50, %s2618_s20  ;;  %v1907_v5 = vpack.c.bf16 %v1902_v22, %v1902_v22  ;;  %v2041_v6 = vpack.c.bf16 %v2036_v34, %v2036_v34  ;;  %v2238_v47 = vmul.f32 %v1706_v44, %v3035_v59  ;;  %v2309_v59 = vld [vmem:[%s3325_s7] sm:$0xff] }
 0x494   : > { %v2112_v7 = vpack.c.bf16 %v2107_v35, %v2107_v35  ;;  %v2040_v42 = vpack.c.bf16 %v2035_v29, %v2035_v29  ;;  %v2240_v13 = vmul.f32 %v1708_v48, %v3037_v60  ;;  %v2475_v35 = vld [vmem:[%s3324_s6 + $0x1c] sm:$0xf] }
 0x495   : > { %2459 = vmatmul.mubr.msk.bf16.vlgmr.msra.gmra.mrb[36].mxu1 %vm1062_vm2, %v1711_v55  ;;  %v2243_v52 = vpack.c.bf16 %v2238_v47, %v2238_v47 }
 0x496   : > { %1961 = vmatprep.mubr.bf16.mxu1 %v2619_v41  ;;  %v2245_v14 = vpack.c.bf16 %v2240_v13, %v2240_v13 }
 0x497   : > { %1912 = vrot.lane.b32.xlu1 %v1906_v9, %s3340_s13  ;;  %1724 = vrot.lane.b32.xlu0 %v1717_v8, %s2618_s20  ;;  %v2466_v9 = vld [vmem:[%s3324_s6 + $0x10] sm:$0xf] }
 0x49b   : > { %1976 = vrot.lane.b32.xlu1 %v1717_v8, %s2617_s19  ;;  %1841 = vrot.lane.b32.xlu0 %v1835_v21, %s3341_s17 }
 0x49f   : > { %1916 = vrot.lane.b32.xlu1 %v1908_v15, %s3340_s13  ;;  %1845 = vrot.lane.b32.xlu0 %v1837_v61, %s3341_s17 }
 0x4a3   : > { %1843 = vrot.lane.b32.xlu1 %v1836_v1, %s3341_s17  ;;  %2116 = vrot.lane.b32.xlu0 %v2110_v3, %s2622_s25 }
 0x4a7   : > { %2045 = vrot.lane.b32.xlu1 %v2039_v4, %s3342_s18  ;;  %1914 = vrot.lane.b32.xlu0 %v1907_v5, %s3340_s13 }
 0x4ab   : > { %2049 = vrot.lane.b32.xlu1 %v2041_v6, %s3342_s18  ;;  %2120 = vrot.lane.b32.xlu0 %v2112_v7, %s2622_s25 }
 0x4af   : > { %2178 = vrot.lane.b32.xlu1 %v1716_v45, %s3343_s23  ;;  %2047 = vrot.lane.b32.xlu0 %v2040_v42, %s3342_s18  ;;  %s296_s18 = sand.u32 1, %s2600_s28  }
 0x4b0   : > { %s2322_s19 = scalar_lea.sflag [#allocation5], %s296_s18 }
 0x4b3   : > { %2118 = vrot.lane.b32.xlu1 %v2111_v36, %s2622_s25  ;;  %2180 = vrot.lane.b32.xlu0 %v1717_v8, %s3343_s23  ;;  %v2478_v36 = vld [vmem:[%s3324_s6 + $0x20] sm:$0xf] }
 0x4b7   : > { %2182 = vrot.lane.b32.xlu1 %v1718_v50, %s3343_s23  ;;  %2249 = vrot.lane.b32.xlu0 %v2243_v52, %s3344_s21  ;;  %v2463_v50 = vld [vmem:[%s3324_s6 + $0xc] sm:$0xf]  ;;  %s2399_s23 = sshll.u32 %s296_s18, 4 }
 0x4b8   : > { %s298_s12 = scalar_lea.vmem [#allocation4], %s2399_s23 }
 0x4b9   : > { %s2336_s24 = sshll.u32 %s298_s12, 4  ;;  %s3278_s24 = int_to_ptr.vmem [resolvable:$true] %s2336_s24 }
 0x4ba   : > { %s2546_s20 = scalar_lea.vmem %s3278_s24, 256 }
 0x4bb   : > { %2251 = vrot.lane.b32.xlu1 %v2244_v56, %s3344_s21  ;;  %2253 = vrot.lane.b32.xlu0 %v2245_v14, %s3344_s21  ;;  %s2487_s21 = sshll.u32 %s2693_s9, 8  ;;  %p2547_p11 = scmp.ne.s32.totalorder %s3278_s24, %s2546_s20 }
 0x4bc   : > { %s3276_s10 = scalar_lea.hbm %s3326_s8, %s2487_s21  ;;  %s2626_s9 = smov [#allocation4]  }
 0x4bd   : > { %p2548_p12 = pnand %p2547_p11, %p2710_p5  ;;  %s2550_s25 = sshll.u32 %s2626_s9, 4  ;;  %s2551_s25 = int_to_ptr.vmem [resolvable:$false] %s2550_s25 }
 0x4be   : > { %s2552_s13 = scalar_lea.vmem %s2551_s25, 512  ;;  %p2553_p0 = scmp.lt.s32.totalorder %s3278_s24, %s2551_s25 }
 0x4bf   : > { %2312 = vperm.xlu1 %2544, %v2309_v59   ;;  %p2549_p13 = pneg %p2548_p12  ;;  %p2554_p1 = scmp.lt.s32.totalorder %s2552_s13, %s2546_s20 }
 0x4c1   : > { %p2555_p2 = por %p2554_p1, %p2553_p0 }
 0x4c3   : > { %p2556_p3 = pnand %p2555_p2, %p2549_p13 }
 0x501   : > { %v1975_v16 = vpop.permute.xlu0 %1974  ;;  %v1723_v17 = vpop.permute.xlu1 %1722 }
 0x505   : > { %v1979_v63 = vpop.permute.xlu0 %1978  ;;  %v1727_v11 = vpop.permute.xlu1 %1726 }
 0x509   : > { %v1913_v60 = vpop.permute.xlu1 %1912  ;;  %v1725_v18 = vpop.permute.xlu0 %1724 }
 0x50a   : > { %v1728_v19 = vsel %vm363_vm13, %v1723_v17, %v1725_v18  ;;  %v1729_v20 = vsel %vm363_vm13, %v1725_v18, %v1727_v11 }
 0x50b   : > { %v1734_v23 = vsel %vm1066_vm7, %v1728_v19, 0  ;;  %2456 = vmatprep.subr.msk.bf16.mxu0 %vm1066_vm7, %v1729_v20 }
 0x50c   : > { %1740 = vmatpush1.bf16.msra.mxu0 %v1734_v23 }
 0x50d   : > { %v1977_v25 = vpop.permute.xlu1 %1976  ;;  %v1842_v26 = vpop.permute.xlu0 %1841 }
 0x50e   : > { %v1980_v38 = vsel %vm648_vm15, %v1975_v16, %v1977_v25  ;;  %v1981_v39 = vsel %vm648_vm15, %v1977_v25, %v1979_v63 }
 0x50f   : > { %2457 = vmatmul.mubr.msk.bf16.vlgmr.msra.gmra.mrb[36].mxu0 %vm1062_vm2, %v2455_v24  ;;  %v1986_v48 = vsel %vm1066_vm7, %v1980_v38, 0 }
 0x510   : > { %1890 = vmatprep.mubr.bf16.mxu0 %v2619_v41 }
 0x511   : > { %v1917_v27 = vpop.permute.xlu1 %1916  ;;  %v1846_v10 = vpop.permute.xlu0 %1845 }
 0x515   : > { %v1844_v28 = vpop.permute.xlu1 %1843  ;;  %v2117_v31 = vpop.permute.xlu0 %2116 }
 0x516   : > { %v1847_v32 = vsel %vm504_vm14, %v1842_v26, %v1844_v28  ;;  %v1848_v33 = vsel %vm504_vm14, %v1844_v28, %v1846_v10 }
 0x517   : > { %v1853_v37 = vsel %vm1066_vm7, %v1847_v32, 0  ;;  %2461 = vmatprep.subr.msk.bf16.mxu0 %vm1066_vm7, %v1848_v33 }
 0x518   : > { %1859 = vmatpush1.bf16.msra.mxu0 %v1853_v37 }
 0x519   : > { %v2046_v43 = vpop.permute.xlu1 %2045  ;;  %2467 = vmatprep.subr.msk.bf16.mxu0 %vm1066_vm7, %v1981_v39  ;;  %v1915_v44 = vpop.permute.xlu0 %1914 }
 0x51a   : > { %v1918_v45 = vsel %vm585_vm0, %v1913_v60, %v1915_v44  ;;  %v1919_v46 = vsel %vm585_vm0, %v1915_v44, %v1917_v27 }
 0x51b   : > { %v1924_v49 = vsel %vm1066_vm7, %v1918_v45, 0  ;;  %2462 = vmatmul.mubr.msk.bf16.vlgmr.msra.gmra.mrb[40].mxu0 %vm1062_vm2, %v2460_v40  ;;  %2464 = vmatprep.subr.msk.bf16.mxu1 %vm1066_vm7, %v1919_v46 }
 0x51c   : > { %1930 = vmatpush1.bf16.msra.mxu1 %v1924_v49  ;;  %1992 = vmatpush1.bf16.msra.mxu0 %v1986_v48 }
 0x51d   : > { %v2050_v51 = vpop.permute.xlu1 %2049  ;;  %v2121_v53 = vpop.permute.xlu0 %2120  ;;  %2023 = vmatprep.mubr.bf16.mxu0 %v2619_v41 }
 0x51f   : > { %2465 = vmatmul.mubr.msk.bf16.vlgmr.msra.gmra.mrb[40].mxu1 %vm1062_vm2, %v2463_v50 }
 0x520   : > { %2094 = vmatprep.mubr.bf16.mxu1 %v2619_v41 }
 0x521   : > { %v2179_v8 = vpop.permute.xlu1 %2178  ;;  %v2048_v54 = vpop.permute.xlu0 %2047 }
 0x522   : > { %v2051_v55 = vsel %vm729_vm1, %v2046_v43, %v2048_v54  ;;  %v2052_v21 = vsel %vm729_vm1, %v2048_v54, %v2050_v51 }
 0x523   : > { %v2057_v57 = vsel %vm1066_vm7, %v2051_v55, 0  ;;  %2468 = vmatmul.mubr.msk.bf16.vlgmr.msra.gmra.mrb[44].mxu0 %vm1062_vm2, %v2466_v9  ;;  %2470 = vmatprep.subr.msk.bf16.mxu1 %vm1066_vm7, %v2052_v21 }
 0x524   : > { %2063 = vmatpush1.bf16.msra.mxu1 %v2057_v57  ;;  %2165 = vmatprep.mubr.bf16.mxu0 %v2619_v41 }
 0x525   : > { %v2119_v15 = vpop.permute.xlu1 %2118  ;;  %v2181_v61 = vpop.permute.xlu0 %2180 }
 0x526   : > { %v2122_v62 = vsel %vm810_vm3, %v2117_v31, %v2119_v15  ;;  %v2123_v0 = vsel %vm810_vm3, %v2119_v15, %v2121_v53  ;;  %v2184_v3 = vsel %vm873_vm4, %v2179_v8, %v2181_v61 }
 0x527   : > { %v2128_v1 = vsel %vm1066_vm7, %v2122_v62, 0  ;;  %2471 = vmatmul.mubr.msk.bf16.vlgmr.msra.gmra.mrb[44].mxu1 %vm1062_vm2, %v2469_v58  ;;  %2473 = vmatprep.subr.msk.bf16.mxu0 %vm1066_vm7, %v2123_v0  ;;  %v2190_v34 = vsel %vm1066_vm7, %v2184_v3, 0 }
 0x528   : > { %2134 = vmatpush1.bf16.msra.mxu0 %v2128_v1  ;;  %2227 = vmatprep.mubr.bf16.mxu1 %v2619_v41 }
 0x529   : > { %v2183_v22 = vpop.permute.xlu1 %2182  ;;  %v2250_v4 = vpop.permute.xlu0 %2249 }
 0x52a   : > { %v2185_v5 = vsel %vm873_vm4, %v2181_v61, %v2183_v22 }
 0x52b   : > { %2474 = vmatmul.mubr.msk.bf16.vlgmr.msra.gmra.mrb[48].mxu0 %vm1062_vm2, %v2472_v30  ;;  %2476 = vmatprep.subr.msk.bf16.mxu1 %vm1066_vm7, %v2185_v5 }
 0x52c   : > { %2196 = vmatpush1.bf16.msra.mxu1 %v2190_v34  ;;  %2298 = vmatprep.mubr.bf16.mxu0 %v2619_v41 }
 0x52d   : > { %v2252_v6 = vpop.permute.xlu1 %2251  ;;  %v2254_v7 = vpop.permute.xlu0 %2253 }
 0x52e   : > { %v2255_v29 = vsel %vm954_vm5, %v2250_v4, %v2252_v6  ;;  %v2256_v42 = vsel %vm954_vm5, %v2252_v6, %v2254_v7 }
 0x52f   : > { %v2261_v2 = vsel %vm1066_vm7, %v2255_v29, 0  ;;  %2477 = vmatmul.mubr.msk.bf16.vlgmr.msra.gmra.mrb[48].mxu1 %vm1062_vm2, %v2475_v35  ;;  %2479 = vmatprep.subr.msk.bf16.mxu0 %vm1066_vm7, %v2256_v42 }
 0x530   : > { %2267 = vmatpush1.bf16.msra.mxu0 %v2261_v2 }
 0x533   : > { %2480 = vmatmul.mubr.msk.bf16.vlgmr.msra.gmra.mrb[52].mxu0 %vm1062_vm2, %v2478_v36 }
 0x53e   : > { %v2313_v61 = vpop.permute.xlu1 %2312 }
 0x568   : > { %v1823_v41 = vpop.f32.mrb[36].mxu1 }
 0x569   : > { %v1825_v47 = vpop.f32.mrb[37].mxu1 }
 0x56a   : > { %v1827_v52 = vpop.f32.mrb[38].mxu1 }
 0x56b   : > { %v1828_v12 = vpop.f32.mrb[39].mxu1 }
 0x5e2   : > { %v1773_v13 = vpop.f32.mrb[36].mxu0 }
 0x5e3   : > { %v1775_v56 = vpop.f32.mrb[37].mxu0  ;;  %v1824_v14 = vadd.f32 %v1823_v41, %v1773_v13 }
 0x5e4   : > { %v1777_v59 = vpop.f32.mrb[38].mxu0  ;;  %v1826_v16 = vadd.f32 %v1825_v47, %v1775_v56 }
 0x5e5   : > { %v1778_v17 = vpop.f32.mrb[39].mxu0 }
 0x5ee   : > { %v1892_v63 = vpop.f32.mrb[40].mxu0 }
 0x5ef   : > { %v1899_v11 = vadd.f32 %v1892_v63, %v1824_v14  ;;  %v1894_v60 = vpop.f32.mrb[41].mxu0 }
 0x5f0   : > { %v1900_v18 = vadd.f32 %v1894_v60, %v1826_v16  ;;  %v1896_v19 = vpop.f32.mrb[42].mxu0 }
 0x5f1   : > { %v1897_v20 = vpop.f32.mrb[43].mxu0 }
 0x5f2   : > { %v1963_v23 = vpop.f32.mrb[40].mxu1 }
 0x5f3   : > { %v1970_v24 = vadd.f32 %v1963_v23, %v1899_v11  ;;  %v1965_v25 = vpop.f32.mrb[41].mxu1 }
 0x5f4   : > { %v1971_v26 = vadd.f32 %v1965_v25, %v1900_v18  ;;  %v1967_v27 = vpop.f32.mrb[42].mxu1 }
 0x5f5   : > { %v1968_v10 = vpop.f32.mrb[43].mxu1 }
 0x5f6   : > { %v2025_v28 = vpop.f32.mrb[44].mxu0 }
 0x5f7   : > { %v2032_v31 = vadd.f32 %v2025_v28, %v1970_v24  ;;  %v2027_v32 = vpop.f32.mrb[45].mxu0 }
 0x5f8   : > { %v2033_v33 = vadd.f32 %v2027_v32, %v1971_v26  ;;  %v2029_v37 = vpop.f32.mrb[46].mxu0 }
 0x5f9   : > { %v2030_v38 = vpop.f32.mrb[47].mxu0 }
 0x5fa   : > { %v2096_v39 = vpop.f32.mrb[44].mxu1 }
 0x5fb   : > { %v2103_v40 = vadd.f32 %v2096_v39, %v2032_v31  ;;  %v2098_v43 = vpop.f32.mrb[45].mxu1 }
 0x5fc   : > { %v2104_v44 = vadd.f32 %v2098_v43, %v2033_v33  ;;  %v2100_v45 = vpop.f32.mrb[46].mxu1 }
 0x5fd   : > { %v2101_v46 = vpop.f32.mrb[47].mxu1 }
 0x5fe   : > { %v2167_v48 = vpop.f32.mrb[48].mxu0 }
 0x5ff   : > { %v2174_v49 = vadd.f32 %v2167_v48, %v2103_v40  ;;  %v2169_v50 = vpop.f32.mrb[49].mxu0 }
 0x600   : > { %v2175_v51 = vadd.f32 %v2169_v50, %v2104_v44  ;;  %v2171_v53 = vpop.f32.mrb[50].mxu0 }
 0x601   : > { %v2172_v9 = vpop.f32.mrb[51].mxu0 }
 0x602   : > { %v2229_v8 = vpop.f32.mrb[48].mxu1 }
 0x603   : > { %v2236_v54 = vadd.f32 %v2229_v8, %v2174_v49  ;;  %v2231_v55 = vpop.f32.mrb[49].mxu1 }
 0x604   : > { %v2237_v21 = vadd.f32 %v2231_v55, %v2175_v51  ;;  %v2233_v57 = vpop.f32.mrb[50].mxu1 }
 0x605   : > { %v2234_v58 = vpop.f32.mrb[51].mxu1 }
 0x606   : > { %v2300_v15 = vpop.f32.mrb[52].mxu0 }
 0x607   : > { %v2307_v62 = vadd.f32 %v2300_v15, %v2236_v54  ;;  %v2302_v0 = vpop.f32.mrb[53].mxu0 }
 0x608   : > { %v2308_v1 = vadd.f32 %v2302_v0, %v2237_v21  ;;  %v2304_v3 = vpop.f32.mrb[54].mxu0 }
 0x609   : > { %v2315_v30 = vadd.f32 %v2313_v61, %v2307_v62  ;;  %v2305_v22 = vpop.f32.mrb[55].mxu0 }
 0x60a   : > { %v2316_v4 = vadd.f32 %v2313_v61, %v2308_v1 }
 0x60b   : > { %v2317_v5 = vmax.f32 %v2315_v30, 0.0 }
 0x60c   : > { %v2318_v34 = vmax.f32 %v2316_v4, 0.0 }
 0x60d   : > { %2319 = vst [vmem:[%s298_s12] sm:$0xff] %v2317_v5 }
 0x60e   : > { %2320 = vst [vmem:[%s298_s12 + $0x8] sm:$0xff] %v2318_v34 }
 0x60f   : > { %2559 = shalt.err (!%p2556_p3)
}
 0x610   : > { %s2560_s17 = scalar_lea.hbm %s3276_s10, 256  ;;  %s2564_s21 = scalar_lea.hbm %s3326_s8, 512 }
 0x611   : > { %p2561_p4 = scmp.ne.s32.totalorder %s3276_s10, %s2560_s17  ;;  %p2565_p9 = scmp.lt.u32.totalorder %s3276_s10, %s3326_s8 }
 0x612   : > { %p2566_p10 = scmp.lt.u32.totalorder %s2564_s21, %s2560_s17  ;;  %p2568_p12 = scmp.lt.u32.totalorder %s2560_s17, %s3276_s10 }
 0x613   : > { %p2562_p7 = pnand %p2561_p4, %p2710_p5 }
 0x614   : > { %p2567_p11 = por %p2566_p10, %p2565_p9 }
 0x615   : > { %p2563_p8 = pneg %p2562_p7 }
 0x616   : > { %p2569_p13 = por %p2568_p12, %p2567_p11 }
 0x618   : > { %p2570_p0 = pnand %p2569_p13, %p2563_p8 }
 0x61a   : > { %2573 = shalt.err (!%p2570_p0)
}
 0x61b   : > { %2488 = dma.vmem_to_hbm [thread:$0]  (%p2710_p5), %s3278_s24, 256, %s3276_s10, %s2322_s19  }
 0x61c PF: > { %p2494_p1 = scmp.ge.s32.totalorder %s2608_s30, 2  ;;  %s2348_s26 = sand.u32 1, %s2596_s27  }
 0x61d   : > { %s2349_s20 = scalar_lea.sflag [#allocation5], %s2348_s26 }
 0x61e   : > { %p2491_p2 = pnand %p2494_p1, %p2714_p6 }
 0x620   : > { %2591 = dma.done.wait (!%p2491_p2), %s2349_s20, 256  }
 0x621   : > { %2593 = vsyncadd (!%p2491_p2), %s2349_s20, 4294967040  ;;  %p18_p3 = scmp.ge.s32.totalorder %s2697_s11, 4   ;;  %s3347_s27 = smov %s2600_s28 }
 0x622   : > { %s3348_s28 = smov %s2604_s29  ;;  %s3349_s29 = smov %s2708_s14 }
 0x623   : > { %s3350_s30 = smov %s2697_s11  ;;  %20 = sbr.rel (!%p18_p3) target bundleno = 3 (0x3), region = 112 }
 0x62a   :  { %2354 = vsyncpa [#allocation5], 1 }
 0x62b   :  { %2356 = vsyncpa [#allocation5 + $0x1], 1 }

</bundles_post_ra>
